<compile_context>
chip_gen: v6e
topology: v6e:2x2x1
jax: 0.10.0
libtpu: 0.0.40
codegen_flags: <defaults>
</compile_context>

<pallas_src>
import jax
import jax.numpy as jnp
from jax.experimental import pallas as pl
from jax.experimental.pallas import tpu as pltpu


def _tqm_kernel(x_ref, w1_ref, b_ref, w2_ref, out_ref, q_ref, q_acc):
    # x_ref : (1, C, T, TS)  VMEM block of the input
    # w1_ref: (CC, C)        SMEM, BN-folded 1x1x1 conv weight
    # b_ref : (CC,)          SMEM, BN-folded bias
    # w2_ref: (CC, K)        SMEM, temporal Kx1x1 conv weight
    # out_ref: (1, C, T, TS) VMEM output block
    # q_ref : (1, T, TS)     VMEM quality block
    # q_acc : (T, TS) f32    VMEM scratch accumulator
    x = x_ref[0]                                   # (C, T, TS)
    C, T, TS = x.shape
    CC, K = w2_ref.shape
    pad = K // 2

    # Per-tap accumulators r[k] = sum_cc w2[cc, k] * ReLU(sum_c w1[cc, c] * x[c] + b[cc]).
    # The CC reduction is done before any temporal shift, so only K small (T, TS)
    # tensors are ever live (never a (CC, T, TS) intermediate).
    r = [None] * K
    for cc in range(CC):
        comp = x[0] * w1_ref[cc, 0]
        for c in range(1, C):
            comp = comp + x[c] * w1_ref[cc, c]
        comp = jnp.maximum(comp + b_ref[cc], 0.0)          # folded BN + ReLU
        for k in range(K):
            term = comp * w2_ref[cc, k]
            r[k] = term if r[k] is None else r[k] + term

    # Temporal K-tap conv with zero padding: q[t] = sum_k r[k][t + k - pad].
    # Center tap initializes the accumulator; the other taps are slice-accumulates
    # over the valid T range only (no zero-padded concatenation copies).
    q_acc[...] = r[pad]
    for k in range(K):
        off = k - pad
        if off == 0:
            continue
        if off > 0:
            q_acc[0:T - off, :] = q_acc[0:T - off, :] + r[k][off:T, :]
        else:
            q_acc[-off:T, :] = q_acc[-off:T, :] + r[k][0:T + off, :]

    qw = jax.nn.sigmoid(q_acc[...])                        # (T, TS)
    q_ref[0] = qw
    out_ref[0] = x * qw[None, :, :]                        # broadcast quality over channels


def _pick_spatial_tile(S, C, T, itemsize=4, budget_bytes=2 << 20):
    """Largest lane-dense (multiple of 128) divisor of S whose x block fits the budget.

    Keeps per-block VMEM (x + out, double-buffered) well inside v7x's 64 MiB while
    giving enough grid steps everywhere to hide HBM DMA.
    """
    if S % 128 != 0:
        return S                      # small / odd spatial extent: use the full dim
    for mult in range(S // 128, 0, -1):
        ts = mult * 128
        if S % ts == 0 and C * T * ts * itemsize <= budget_bytes:
            return ts
    return 128


@jax.jit
def temporal_quality_module(x, w1, b1, gamma, beta, run_mean, run_var, w2, eps=1e-5):
    """x: (B, C, T, W, H) float32. Returns (out (B,C,T,W,H), quality (B,T,W,H))."""
    B, C, T, W, H = x.shape
    S = W * H
    CC, K = w2.shape

    # Fold eval-mode BatchNorm into the 1x1x1 conv (pure parameter algebra).
    # TODO(synk): training-mode BatchNorm (batch statistics) cannot be folded this way.
    scale = gamma / jnp.sqrt(run_var + eps)                        # (CC,)
    w1_eff = (w1 * scale[:, None]).astype(jnp.float32)             # (CC, C)
    b_eff = (scale * (b1 - run_mean) + beta).astype(jnp.float32)   # (CC,)

    x_flat = x.reshape(B, C, T, S).astype(jnp.float32)

    TS = _pick_spatial_tile(S, C, T)
    grid = (B, S // TS)

    out_flat, q_flat = pl.pallas_call(
        _tqm_kernel,
        out_shape=(
            jax.ShapeDtypeStruct((B, C, T, S), jnp.float32),
            jax.ShapeDtypeStruct((B, T, S), jnp.float32),
        ),
        grid=grid,
        in_specs=[
            pl.BlockSpec((1, C, T, TS), lambda b, s: (b, 0, 0, s)),
            pl.BlockSpec(memory_space=pltpu.MemorySpace.SMEM),   # w1 (BN-folded)
            pl.BlockSpec(memory_space=pltpu.MemorySpace.SMEM),   # bias (BN-folded)
            pl.BlockSpec(memory_space=pltpu.MemorySpace.SMEM),   # temporal conv weight
        ],
        out_specs=(
            pl.BlockSpec((1, C, T, TS), lambda b, s: (b, 0, 0, s)),
            pl.BlockSpec((1, T, TS), lambda b, s: (b, 0, s)),
        ),
        scratch_shapes=[pltpu.VMEM((T, TS), jnp.float32)],
        compiler_params=pltpu.CompilerParams(
            dimension_semantics=("parallel", "parallel"),
        ),
    )(x_flat, w1_eff, b_eff, w2.astype(jnp.float32))

    return out_flat.reshape(B, C, T, W, H), q_flat.reshape(B, T, W, H)


def _reference(x, w1, b1, gamma, beta, run_mean, run_var, w2, eps=1e-5):
    """Pure-JAX reference of the PyTorch forward (eval-mode BN)."""
    B, C, T, W, H = x.shape
    CC, K = w2.shape
    pad = K // 2
    comp = jnp.einsum('oc,bcTWH->boTWH', w1, x) + b1[None, :, None, None, None]
    comp = (comp - run_mean[None, :, None, None, None]) / jnp.sqrt(
        run_var[None, :, None, None, None] + eps)
    comp = comp * gamma[None, :, None, None, None] + beta[None, :, None, None, None]
    comp = jnp.maximum(comp, 0.0)
    comp_pad = jnp.pad(comp, ((0, 0), (0, 0), (pad, pad), (0, 0), (0, 0)))
    q = jnp.zeros((B, T, W, H), jnp.float32)
    for k in range(K):
        q = q + jnp.einsum('o,boTWH->bTWH', w2[:, k], comp_pad[:, :, k:k + T])
    qw = jax.nn.sigmoid(q)
    out = x * qw[:, None]
    return out, qw


if __name__ == "__main__":
    # Small shapes consistent with the module: B=2, C=4, T=8, W=H=16, compressed_c=8, kernel=5
    B, C, T, W, H = 2, 4, 8, 16, 16
    CC, K = 8, 5

    key = jax.random.PRNGKey(0)
    k_x, k_w1, k_b1, k_g, k_be, k_w2 = jax.random.split(key, 6)

    x = jax.random.normal(k_x, (B, C, T, W, H), jnp.float32)

    # Conv3d(input_c, compressed_c, [1,1,1]) weight (CC, C, 1,1,1) -> (CC, C), bias (CC,)
    w1 = jax.random.normal(k_w1, (CC, C), jnp.float32) * 0.2
    b1 = jax.random.normal(k_b1, (CC,), jnp.float32) * 0.1
    # BatchNorm3d(compressed_c) params (eval mode)
    gamma = 1.0 + 0.1 * jax.random.normal(k_g, (CC,), jnp.float32)
    beta = 0.1 * jax.random.normal(k_be, (CC,), jnp.float32)
    run_mean = jnp.zeros((CC,), jnp.float32)
    run_var = jnp.ones((CC,), jnp.float32)
    # Conv3d(compressed_c, 1, [K,1,1], bias=False) weight (1, CC, K, 1, 1) -> (CC, K)
    w2 = jax.random.normal(k_w2, (CC, K), jnp.float32) * 0.2

    out, qw = temporal_quality_module(x, w1, b1, gamma, beta, run_mean, run_var, w2)
    jax.block_until_ready((out, qw))

    out_ref, qw_ref = _reference(x, w1, b1, gamma, beta, run_mean, run_var, w2)
    assert out.shape == (B, C, T, W, H) and qw.shape == (B, T, W, H)
    assert jnp.allclose(out, out_ref, atol=1e-5, rtol=1e-5)
    assert jnp.allclose(qw, qw_ref, atol=1e-5, rtol=1e-5)

    print("KERNEL_OK")
</pallas_src>

<mosaic_0001>
module attributes {stable_mosaic.version = 11 : i64} {
  func.func @_tqm_kernel(%arg0: i32, %arg1: i32, %arg2: memref<1x4x8x256xf32, #tpu.memory_space<vmem>>, %arg3: memref<8x4xf32, #tpu.memory_space<smem>>, %arg4: memref<8xf32, #tpu.memory_space<smem>>, %arg5: memref<8x5xf32, #tpu.memory_space<smem>>, %arg6: memref<1x4x8x256xf32, #tpu.memory_space<vmem>>, %arg7: memref<1x8x256xf32, #tpu.memory_space<vmem>>, %arg8: memref<8x256xf32, #tpu.memory_space<vmem>>) attributes {dimension_semantics = [#tpu.dimension_semantics<parallel>, #tpu.dimension_semantics<parallel>], iteration_bounds = array<i64: 2, 1>, scalar_prefetch = 0 : i64, scratch_operands = 1 : i64, tpu.core_type = #tpu.core_type<tc>, window_params = [{transform_indices = @transform_0, window_bounds = array<i64: 1, 4, 8, 256>}, {transform_indices = @transform_1, window_bounds = array<i64: 8, 4>}, {transform_indices = @transform_2, window_bounds = array<i64: 8>}, {transform_indices = @transform_3, window_bounds = array<i64: 8, 5>}, {transform_indices = @transform_4, window_bounds = array<i64: 1, 4, 8, 256>}, {transform_indices = @transform_5, window_bounds = array<i64: 1, 8, 256>}]} {
    %c0 = arith.constant 0 : index
    %c0_0 = arith.constant 0 : index
    %c0_1 = arith.constant 0 : index
    %c0_2 = arith.constant 0 : index
    %0 = vector.load %arg2[%c0, %c0_0, %c0_1, %c0_2] : memref<1x4x8x256xf32, #tpu.memory_space<vmem>>, vector<1x4x8x256xf32>
    %1 = vector.shape_cast %0 : vector<1x4x8x256xf32> to vector<4x8x256xf32>
    %2 = vector.extract_strided_slice %1 {offsets = [0, 0, 0], sizes = [1, 8, 256], strides = [1, 1, 1]} : vector<4x8x256xf32> to vector<1x8x256xf32>
    %3 = vector.shape_cast %2 : vector<1x8x256xf32> to vector<8x256xf32>
    %c0_3 = arith.constant 0 : index
    %c0_4 = arith.constant 0 : index
    %4 = memref.load %arg3[%c0_3, %c0_4] : memref<8x4xf32, #tpu.memory_space<smem>>
    %5 = vector.broadcast %4 : f32 to vector<8x256xf32>
    %6 = arith.mulf %3, %5 : vector<8x256xf32>
    %7 = vector.extract_strided_slice %1 {offsets = [1, 0, 0], sizes = [1, 8, 256], strides = [1, 1, 1]} : vector<4x8x256xf32> to vector<1x8x256xf32>
    %8 = vector.shape_cast %7 : vector<1x8x256xf32> to vector<8x256xf32>
    %c0_5 = arith.constant 0 : index
    %c1 = arith.constant 1 : index
    %9 = memref.load %arg3[%c0_5, %c1] : memref<8x4xf32, #tpu.memory_space<smem>>
    %10 = vector.broadcast %9 : f32 to vector<8x256xf32>
    %11 = arith.mulf %8, %10 : vector<8x256xf32>
    %12 = arith.addf %6, %11 : vector<8x256xf32>
    %13 = vector.extract_strided_slice %1 {offsets = [2, 0, 0], sizes = [1, 8, 256], strides = [1, 1, 1]} : vector<4x8x256xf32> to vector<1x8x256xf32>
    %14 = vector.shape_cast %13 : vector<1x8x256xf32> to vector<8x256xf32>
    %c0_6 = arith.constant 0 : index
    %c2 = arith.constant 2 : index
    %15 = memref.load %arg3[%c0_6, %c2] : memref<8x4xf32, #tpu.memory_space<smem>>
    %16 = vector.broadcast %15 : f32 to vector<8x256xf32>
    %17 = arith.mulf %14, %16 : vector<8x256xf32>
    %18 = arith.addf %12, %17 : vector<8x256xf32>
    %19 = vector.extract_strided_slice %1 {offsets = [3, 0, 0], sizes = [1, 8, 256], strides = [1, 1, 1]} : vector<4x8x256xf32> to vector<1x8x256xf32>
    %20 = vector.shape_cast %19 : vector<1x8x256xf32> to vector<8x256xf32>
    %c0_7 = arith.constant 0 : index
    %c3 = arith.constant 3 : index
    %21 = memref.load %arg3[%c0_7, %c3] : memref<8x4xf32, #tpu.memory_space<smem>>
    %22 = vector.broadcast %21 : f32 to vector<8x256xf32>
    %23 = arith.mulf %20, %22 : vector<8x256xf32>
    %24 = arith.addf %18, %23 : vector<8x256xf32>
    %c0_8 = arith.constant 0 : index
    %25 = memref.load %arg4[%c0_8] : memref<8xf32, #tpu.memory_space<smem>>
    %26 = vector.broadcast %25 : f32 to vector<8x256xf32>
    %27 = arith.addf %24, %26 : vector<8x256xf32>
    %cst = arith.constant 0.000000e+00 : f32
    %28 = vector.broadcast %cst : f32 to vector<8x256xf32>
    %29 = arith.maximumf %27, %28 : vector<8x256xf32>
    %c0_9 = arith.constant 0 : index
    %c0_10 = arith.constant 0 : index
    %30 = memref.load %arg5[%c0_9, %c0_10] : memref<8x5xf32, #tpu.memory_space<smem>>
    %31 = vector.broadcast %30 : f32 to vector<8x256xf32>
    %32 = arith.mulf %29, %31 : vector<8x256xf32>
    %c0_11 = arith.constant 0 : index
    %c1_12 = arith.constant 1 : index
    %33 = memref.load %arg5[%c0_11, %c1_12] : memref<8x5xf32, #tpu.memory_space<smem>>
    %34 = vector.broadcast %33 : f32 to vector<8x256xf32>
    %35 = arith.mulf %29, %34 : vector<8x256xf32>
    %c0_13 = arith.constant 0 : index
    %c2_14 = arith.constant 2 : index
    %36 = memref.load %arg5[%c0_13, %c2_14] : memref<8x5xf32, #tpu.memory_space<smem>>
    %37 = vector.broadcast %36 : f32 to vector<8x256xf32>
    %38 = arith.mulf %29, %37 : vector<8x256xf32>
    %c0_15 = arith.constant 0 : index
    %c3_16 = arith.constant 3 : index
    %39 = memref.load %arg5[%c0_15, %c3_16] : memref<8x5xf32, #tpu.memory_space<smem>>
    %40 = vector.broadcast %39 : f32 to vector<8x256xf32>
    %41 = arith.mulf %29, %40 : vector<8x256xf32>
    %c0_17 = arith.constant 0 : index
    %c4 = arith.constant 4 : index
    %42 = memref.load %arg5[%c0_17, %c4] : memref<8x5xf32, #tpu.memory_space<smem>>
    %43 = vector.broadcast %42 : f32 to vector<8x256xf32>
    %44 = arith.mulf %29, %43 : vector<8x256xf32>
    %45 = vector.extract_strided_slice %1 {offsets = [0, 0, 0], sizes = [1, 8, 256], strides = [1, 1, 1]} : vector<4x8x256xf32> to vector<1x8x256xf32>
    %46 = vector.shape_cast %45 : vector<1x8x256xf32> to vector<8x256xf32>
    %c1_18 = arith.constant 1 : index
    %c0_19 = arith.constant 0 : index
    %47 = memref.load %arg3[%c1_18, %c0_19] : memref<8x4xf32, #tpu.memory_space<smem>>
    %48 = vector.broadcast %47 : f32 to vector<8x256xf32>
    %49 = arith.mulf %46, %48 : vector<8x256xf32>
    %50 = vector.extract_strided_slice %1 {offsets = [1, 0, 0], sizes = [1, 8, 256], strides = [1, 1, 1]} : vector<4x8x256xf32> to vector<1x8x256xf32>
    %51 = vector.shape_cast %50 : vector<1x8x256xf32> to vector<8x256xf32>
    %c1_20 = arith.constant 1 : index
    %c1_21 = arith.constant 1 : index
    %52 = memref.load %arg3[%c1_20, %c1_21] : memref<8x4xf32, #tpu.memory_space<smem>>
    %53 = vector.broadcast %52 : f32 to vector<8x256xf32>
    %54 = arith.mulf %51, %53 : vector<8x256xf32>
    %55 = arith.addf %49, %54 : vector<8x256xf32>
    %56 = vector.extract_strided_slice %1 {offsets = [2, 0, 0], sizes = [1, 8, 256], strides = [1, 1, 1]} : vector<4x8x256xf32> to vector<1x8x256xf32>
    %57 = vector.shape_cast %56 : vector<1x8x256xf32> to vector<8x256xf32>
    %c1_22 = arith.constant 1 : index
    %c2_23 = arith.constant 2 : index
    %58 = memref.load %arg3[%c1_22, %c2_23] : memref<8x4xf32, #tpu.memory_space<smem>>
    %59 = vector.broadcast %58 : f32 to vector<8x256xf32>
    %60 = arith.mulf %57, %59 : vector<8x256xf32>
    %61 = arith.addf %55, %60 : vector<8x256xf32>
    %62 = vector.extract_strided_slice %1 {offsets = [3, 0, 0], sizes = [1, 8, 256], strides = [1, 1, 1]} : vector<4x8x256xf32> to vector<1x8x256xf32>
    %63 = vector.shape_cast %62 : vector<1x8x256xf32> to vector<8x256xf32>
    %c1_24 = arith.constant 1 : index
    %c3_25 = arith.constant 3 : index
    %64 = memref.load %arg3[%c1_24, %c3_25] : memref<8x4xf32, #tpu.memory_space<smem>>
    %65 = vector.broadcast %64 : f32 to vector<8x256xf32>
    %66 = arith.mulf %63, %65 : vector<8x256xf32>
    %67 = arith.addf %61, %66 : vector<8x256xf32>
    %c1_26 = arith.constant 1 : index
    %68 = memref.load %arg4[%c1_26] : memref<8xf32, #tpu.memory_space<smem>>
    %69 = vector.broadcast %68 : f32 to vector<8x256xf32>
    %70 = arith.addf %67, %69 : vector<8x256xf32>
    %cst_27 = arith.constant 0.000000e+00 : f32
    %71 = vector.broadcast %cst_27 : f32 to vector<8x256xf32>
    %72 = arith.maximumf %70, %71 : vector<8x256xf32>
    %c1_28 = arith.constant 1 : index
    %c0_29 = arith.constant 0 : index
    %73 = memref.load %arg5[%c1_28, %c0_29] : memref<8x5xf32, #tpu.memory_space<smem>>
    %74 = vector.broadcast %73 : f32 to vector<8x256xf32>
    %75 = arith.mulf %72, %74 : vector<8x256xf32>
    %76 = arith.addf %32, %75 : vector<8x256xf32>
    %c1_30 = arith.constant 1 : index
    %c1_31 = arith.constant 1 : index
    %77 = memref.load %arg5[%c1_30, %c1_31] : memref<8x5xf32, #tpu.memory_space<smem>>
    %78 = vector.broadcast %77 : f32 to vector<8x256xf32>
    %79 = arith.mulf %72, %78 : vector<8x256xf32>
    %80 = arith.addf %35, %79 : vector<8x256xf32>
    %c1_32 = arith.constant 1 : index
    %c2_33 = arith.constant 2 : index
    %81 = memref.load %arg5[%c1_32, %c2_33] : memref<8x5xf32, #tpu.memory_space<smem>>
    %82 = vector.broadcast %81 : f32 to vector<8x256xf32>
    %83 = arith.mulf %72, %82 : vector<8x256xf32>
    %84 = arith.addf %38, %83 : vector<8x256xf32>
    %c1_34 = arith.constant 1 : index
    %c3_35 = arith.constant 3 : index
    %85 = memref.load %arg5[%c1_34, %c3_35] : memref<8x5xf32, #tpu.memory_space<smem>>
    %86 = vector.broadcast %85 : f32 to vector<8x256xf32>
    %87 = arith.mulf %72, %86 : vector<8x256xf32>
    %88 = arith.addf %41, %87 : vector<8x256xf32>
    %c1_36 = arith.constant 1 : index
    %c4_37 = arith.constant 4 : index
    %89 = memref.load %arg5[%c1_36, %c4_37] : memref<8x5xf32, #tpu.memory_space<smem>>
    %90 = vector.broadcast %89 : f32 to vector<8x256xf32>
    %91 = arith.mulf %72, %90 : vector<8x256xf32>
    %92 = arith.addf %44, %91 : vector<8x256xf32>
    %93 = vector.extract_strided_slice %1 {offsets = [0, 0, 0], sizes = [1, 8, 256], strides = [1, 1, 1]} : vector<4x8x256xf32> to vector<1x8x256xf32>
    %94 = vector.shape_cast %93 : vector<1x8x256xf32> to vector<8x256xf32>
    %c2_38 = arith.constant 2 : index
    %c0_39 = arith.constant 0 : index
    %95 = memref.load %arg3[%c2_38, %c0_39] : memref<8x4xf32, #tpu.memory_space<smem>>
    %96 = vector.broadcast %95 : f32 to vector<8x256xf32>
    %97 = arith.mulf %94, %96 : vector<8x256xf32>
    %98 = vector.extract_strided_slice %1 {offsets = [1, 0, 0], sizes = [1, 8, 256], strides = [1, 1, 1]} : vector<4x8x256xf32> to vector<1x8x256xf32>
    %99 = vector.shape_cast %98 : vector<1x8x256xf32> to vector<8x256xf32>
    %c2_40 = arith.constant 2 : index
    %c1_41 = arith.constant 1 : index
    %100 = memref.load %arg3[%c2_40, %c1_41] : memref<8x4xf32, #tpu.memory_space<smem>>
    %101 = vector.broadcast %100 : f32 to vector<8x256xf32>
    %102 = arith.mulf %99, %101 : vector<8x256xf32>
    %103 = arith.addf %97, %102 : vector<8x256xf32>
    %104 = vector.extract_strided_slice %1 {offsets = [2, 0, 0], sizes = [1, 8, 256], strides = [1, 1, 1]} : vector<4x8x256xf32> to vector<1x8x256xf32>
    %105 = vector.shape_cast %104 : vector<1x8x256xf32> to vector<8x256xf32>
    %c2_42 = arith.constant 2 : index
    %c2_43 = arith.constant 2 : index
    %106 = memref.load %arg3[%c2_42, %c2_43] : memref<8x4xf32, #tpu.memory_space<smem>>
    %107 = vector.broadcast %106 : f32 to vector<8x256xf32>
    %108 = arith.mulf %105, %107 : vector<8x256xf32>
    %109 = arith.addf %103, %108 : vector<8x256xf32>
    %110 = vector.extract_strided_slice %1 {offsets = [3, 0, 0], sizes = [1, 8, 256], strides = [1, 1, 1]} : vector<4x8x256xf32> to vector<1x8x256xf32>
    %111 = vector.shape_cast %110 : vector<1x8x256xf32> to vector<8x256xf32>
    %c2_44 = arith.constant 2 : index
    %c3_45 = arith.constant 3 : index
    %112 = memref.load %arg3[%c2_44, %c3_45] : memref<8x4xf32, #tpu.memory_space<smem>>
    %113 = vector.broadcast %112 : f32 to vector<8x256xf32>
    %114 = arith.mulf %111, %113 : vector<8x256xf32>
    %115 = arith.addf %109, %114 : vector<8x256xf32>
    %c2_46 = arith.constant 2 : index
    %116 = memref.load %arg4[%c2_46] : memref<8xf32, #tpu.memory_space<smem>>
    %117 = vector.broadcast %116 : f32 to vector<8x256xf32>
    %118 = arith.addf %115, %117 : vector<8x256xf32>
    %cst_47 = arith.constant 0.000000e+00 : f32
    %119 = vector.broadcast %cst_47 : f32 to vector<8x256xf32>
    %120 = arith.maximumf %118, %119 : vector<8x256xf32>
    %c2_48 = arith.constant 2 : index
    %c0_49 = arith.constant 0 : index
    %121 = memref.load %arg5[%c2_48, %c0_49] : memref<8x5xf32, #tpu.memory_space<smem>>
    %122 = vector.broadcast %121 : f32 to vector<8x256xf32>
    %123 = arith.mulf %120, %122 : vector<8x256xf32>
    %124 = arith.addf %76, %123 : vector<8x256xf32>
    %c2_50 = arith.constant 2 : index
    %c1_51 = arith.constant 1 : index
    %125 = memref.load %arg5[%c2_50, %c1_51] : memref<8x5xf32, #tpu.memory_space<smem>>
    %126 = vector.broadcast %125 : f32 to vector<8x256xf32>
    %127 = arith.mulf %120, %126 : vector<8x256xf32>
    %128 = arith.addf %80, %127 : vector<8x256xf32>
    %c2_52 = arith.constant 2 : index
    %c2_53 = arith.constant 2 : index
    %129 = memref.load %arg5[%c2_52, %c2_53] : memref<8x5xf32, #tpu.memory_space<smem>>
    %130 = vector.broadcast %129 : f32 to vector<8x256xf32>
    %131 = arith.mulf %120, %130 : vector<8x256xf32>
    %132 = arith.addf %84, %131 : vector<8x256xf32>
    %c2_54 = arith.constant 2 : index
    %c3_55 = arith.constant 3 : index
    %133 = memref.load %arg5[%c2_54, %c3_55] : memref<8x5xf32, #tpu.memory_space<smem>>
    %134 = vector.broadcast %133 : f32 to vector<8x256xf32>
    %135 = arith.mulf %120, %134 : vector<8x256xf32>
    %136 = arith.addf %88, %135 : vector<8x256xf32>
    %c2_56 = arith.constant 2 : index
    %c4_57 = arith.constant 4 : index
    %137 = memref.load %arg5[%c2_56, %c4_57] : memref<8x5xf32, #tpu.memory_space<smem>>
    %138 = vector.broadcast %137 : f32 to vector<8x256xf32>
    %139 = arith.mulf %120, %138 : vector<8x256xf32>
    %140 = arith.addf %92, %139 : vector<8x256xf32>
    %141 = vector.extract_strided_slice %1 {offsets = [0, 0, 0], sizes = [1, 8, 256], strides = [1, 1, 1]} : vector<4x8x256xf32> to vector<1x8x256xf32>
    %142 = vector.shape_cast %141 : vector<1x8x256xf32> to vector<8x256xf32>
    %c3_58 = arith.constant 3 : index
    %c0_59 = arith.constant 0 : index
    %143 = memref.load %arg3[%c3_58, %c0_59] : memref<8x4xf32, #tpu.memory_space<smem>>
    %144 = vector.broadcast %143 : f32 to vector<8x256xf32>
    %145 = arith.mulf %142, %144 : vector<8x256xf32>
    %146 = vector.extract_strided_slice %1 {offsets = [1, 0, 0], sizes = [1, 8, 256], strides = [1, 1, 1]} : vector<4x8x256xf32> to vector<1x8x256xf32>
    %147 = vector.shape_cast %146 : vector<1x8x256xf32> to vector<8x256xf32>
    %c3_60 = arith.constant 3 : index
    %c1_61 = arith.constant 1 : index
    %148 = memref.load %arg3[%c3_60, %c1_61] : memref<8x4xf32, #tpu.memory_space<smem>>
    %149 = vector.broadcast %148 : f32 to vector<8x256xf32>
    %150 = arith.mulf %147, %149 : vector<8x256xf32>
    %151 = arith.addf %145, %150 : vector<8x256xf32>
    %152 = vector.extract_strided_slice %1 {offsets = [2, 0, 0], sizes = [1, 8, 256], strides = [1, 1, 1]} : vector<4x8x256xf32> to vector<1x8x256xf32>
    %153 = vector.shape_cast %152 : vector<1x8x256xf32> to vector<8x256xf32>
    %c3_62 = arith.constant 3 : index
    %c2_63 = arith.constant 2 : index
    %154 = memref.load %arg3[%c3_62, %c2_63] : memref<8x4xf32, #tpu.memory_space<smem>>
    %155 = vector.broadcast %154 : f32 to vector<8x256xf32>
    %156 = arith.mulf %153, %155 : vector<8x256xf32>
    %157 = arith.addf %151, %156 : vector<8x256xf32>
    %158 = vector.extract_strided_slice %1 {offsets = [3, 0, 0], sizes = [1, 8, 256], strides = [1, 1, 1]} : vector<4x8x256xf32> to vector<1x8x256xf32>
    %159 = vector.shape_cast %158 : vector<1x8x256xf32> to vector<8x256xf32>
    %c3_64 = arith.constant 3 : index
    %c3_65 = arith.constant 3 : index
    %160 = memref.load %arg3[%c3_64, %c3_65] : memref<8x4xf32, #tpu.memory_space<smem>>
    %161 = vector.broadcast %160 : f32 to vector<8x256xf32>
    %162 = arith.mulf %159, %161 : vector<8x256xf32>
    %163 = arith.addf %157, %162 : vector<8x256xf32>
    %c3_66 = arith.constant 3 : index
    %164 = memref.load %arg4[%c3_66] : memref<8xf32, #tpu.memory_space<smem>>
    %165 = vector.broadcast %164 : f32 to vector<8x256xf32>
    %166 = arith.addf %163, %165 : vector<8x256xf32>
    %cst_67 = arith.constant 0.000000e+00 : f32
    %167 = vector.broadcast %cst_67 : f32 to vector<8x256xf32>
    %168 = arith.maximumf %166, %167 : vector<8x256xf32>
    %c3_68 = arith.constant 3 : index
    %c0_69 = arith.constant 0 : index
    %169 = memref.load %arg5[%c3_68, %c0_69] : memref<8x5xf32, #tpu.memory_space<smem>>
    %170 = vector.broadcast %169 : f32 to vector<8x256xf32>
    %171 = arith.mulf %168, %170 : vector<8x256xf32>
    %172 = arith.addf %124, %171 : vector<8x256xf32>
    %c3_70 = arith.constant 3 : index
    %c1_71 = arith.constant 1 : index
    %173 = memref.load %arg5[%c3_70, %c1_71] : memref<8x5xf32, #tpu.memory_space<smem>>
    %174 = vector.broadcast %173 : f32 to vector<8x256xf32>
    %175 = arith.mulf %168, %174 : vector<8x256xf32>
    %176 = arith.addf %128, %175 : vector<8x256xf32>
    %c3_72 = arith.constant 3 : index
    %c2_73 = arith.constant 2 : index
    %177 = memref.load %arg5[%c3_72, %c2_73] : memref<8x5xf32, #tpu.memory_space<smem>>
    %178 = vector.broadcast %177 : f32 to vector<8x256xf32>
    %179 = arith.mulf %168, %178 : vector<8x256xf32>
    %180 = arith.addf %132, %179 : vector<8x256xf32>
    %c3_74 = arith.constant 3 : index
    %c3_75 = arith.constant 3 : index
    %181 = memref.load %arg5[%c3_74, %c3_75] : memref<8x5xf32, #tpu.memory_space<smem>>
    %182 = vector.broadcast %181 : f32 to vector<8x256xf32>
    %183 = arith.mulf %168, %182 : vector<8x256xf32>
    %184 = arith.addf %136, %183 : vector<8x256xf32>
    %c3_76 = arith.constant 3 : index
    %c4_77 = arith.constant 4 : index
    %185 = memref.load %arg5[%c3_76, %c4_77] : memref<8x5xf32, #tpu.memory_space<smem>>
    %186 = vector.broadcast %185 : f32 to vector<8x256xf32>
    %187 = arith.mulf %168, %186 : vector<8x256xf32>
    %188 = arith.addf %140, %187 : vector<8x256xf32>
    %189 = vector.extract_strided_slice %1 {offsets = [0, 0, 0], sizes = [1, 8, 256], strides = [1, 1, 1]} : vector<4x8x256xf32> to vector<1x8x256xf32>
    %190 = vector.shape_cast %189 : vector<1x8x256xf32> to vector<8x256xf32>
    %c4_78 = arith.constant 4 : index
    %c0_79 = arith.constant 0 : index
    %191 = memref.load %arg3[%c4_78, %c0_79] : memref<8x4xf32, #tpu.memory_space<smem>>
    %192 = vector.broadcast %191 : f32 to vector<8x256xf32>
    %193 = arith.mulf %190, %192 : vector<8x256xf32>
    %194 = vector.extract_strided_slice %1 {offsets = [1, 0, 0], sizes = [1, 8, 256], strides = [1, 1, 1]} : vector<4x8x256xf32> to vector<1x8x256xf32>
    %195 = vector.shape_cast %194 : vector<1x8x256xf32> to vector<8x256xf32>
    %c4_80 = arith.constant 4 : index
    %c1_81 = arith.constant 1 : index
    %196 = memref.load %arg3[%c4_80, %c1_81] : memref<8x4xf32, #tpu.memory_space<smem>>
    %197 = vector.broadcast %196 : f32 to vector<8x256xf32>
    %198 = arith.mulf %195, %197 : vector<8x256xf32>
    %199 = arith.addf %193, %198 : vector<8x256xf32>
    %200 = vector.extract_strided_slice %1 {offsets = [2, 0, 0], sizes = [1, 8, 256], strides = [1, 1, 1]} : vector<4x8x256xf32> to vector<1x8x256xf32>
    %201 = vector.shape_cast %200 : vector<1x8x256xf32> to vector<8x256xf32>
    %c4_82 = arith.constant 4 : index
    %c2_83 = arith.constant 2 : index
    %202 = memref.load %arg3[%c4_82, %c2_83] : memref<8x4xf32, #tpu.memory_space<smem>>
    %203 = vector.broadcast %202 : f32 to vector<8x256xf32>
    %204 = arith.mulf %201, %203 : vector<8x256xf32>
    %205 = arith.addf %199, %204 : vector<8x256xf32>
    %206 = vector.extract_strided_slice %1 {offsets = [3, 0, 0], sizes = [1, 8, 256], strides = [1, 1, 1]} : vector<4x8x256xf32> to vector<1x8x256xf32>
    %207 = vector.shape_cast %206 : vector<1x8x256xf32> to vector<8x256xf32>
    %c4_84 = arith.constant 4 : index
    %c3_85 = arith.constant 3 : index
    %208 = memref.load %arg3[%c4_84, %c3_85] : memref<8x4xf32, #tpu.memory_space<smem>>
    %209 = vector.broadcast %208 : f32 to vector<8x256xf32>
    %210 = arith.mulf %207, %209 : vector<8x256xf32>
    %211 = arith.addf %205, %210 : vector<8x256xf32>
    %c4_86 = arith.constant 4 : index
    %212 = memref.load %arg4[%c4_86] : memref<8xf32, #tpu.memory_space<smem>>
    %213 = vector.broadcast %212 : f32 to vector<8x256xf32>
    %214 = arith.addf %211, %213 : vector<8x256xf32>
    %cst_87 = arith.constant 0.000000e+00 : f32
    %215 = vector.broadcast %cst_87 : f32 to vector<8x256xf32>
    %216 = arith.maximumf %214, %215 : vector<8x256xf32>
    %c4_88 = arith.constant 4 : index
    %c0_89 = arith.constant 0 : index
    %217 = memref.load %arg5[%c4_88, %c0_89] : memref<8x5xf32, #tpu.memory_space<smem>>
    %218 = vector.broadcast %217 : f32 to vector<8x256xf32>
    %219 = arith.mulf %216, %218 : vector<8x256xf32>
    %220 = arith.addf %172, %219 : vector<8x256xf32>
    %c4_90 = arith.constant 4 : index
    %c1_91 = arith.constant 1 : index
    %221 = memref.load %arg5[%c4_90, %c1_91] : memref<8x5xf32, #tpu.memory_space<smem>>
    %222 = vector.broadcast %221 : f32 to vector<8x256xf32>
    %223 = arith.mulf %216, %222 : vector<8x256xf32>
    %224 = arith.addf %176, %223 : vector<8x256xf32>
    %c4_92 = arith.constant 4 : index
    %c2_93 = arith.constant 2 : index
    %225 = memref.load %arg5[%c4_92, %c2_93] : memref<8x5xf32, #tpu.memory_space<smem>>
    %226 = vector.broadcast %225 : f32 to vector<8x256xf32>
    %227 = arith.mulf %216, %226 : vector<8x256xf32>
    %228 = arith.addf %180, %227 : vector<8x256xf32>
    %c4_94 = arith.constant 4 : index
    %c3_95 = arith.constant 3 : index
    %229 = memref.load %arg5[%c4_94, %c3_95] : memref<8x5xf32, #tpu.memory_space<smem>>
    %230 = vector.broadcast %229 : f32 to vector<8x256xf32>
    %231 = arith.mulf %216, %230 : vector<8x256xf32>
    %232 = arith.addf %184, %231 : vector<8x256xf32>
    %c4_96 = arith.constant 4 : index
    %c4_97 = arith.constant 4 : index
    %233 = memref.load %arg5[%c4_96, %c4_97] : memref<8x5xf32, #tpu.memory_space<smem>>
    %234 = vector.broadcast %233 : f32 to vector<8x256xf32>
    %235 = arith.mulf %216, %234 : vector<8x256xf32>
    %236 = arith.addf %188, %235 : vector<8x256xf32>
    %237 = vector.extract_strided_slice %1 {offsets = [0, 0, 0], sizes = [1, 8, 256], strides = [1, 1, 1]} : vector<4x8x256xf32> to vector<1x8x256xf32>
    %238 = vector.shape_cast %237 : vector<1x8x256xf32> to vector<8x256xf32>
    %c5 = arith.constant 5 : index
    %c0_98 = arith.constant 0 : index
    %239 = memref.load %arg3[%c5, %c0_98] : memref<8x4xf32, #tpu.memory_space<smem>>
    %240 = vector.broadcast %239 : f32 to vector<8x256xf32>
    %241 = arith.mulf %238, %240 : vector<8x256xf32>
    %242 = vector.extract_strided_slice %1 {offsets = [1, 0, 0], sizes = [1, 8, 256], strides = [1, 1, 1]} : vector<4x8x256xf32> to vector<1x8x256xf32>
    %243 = vector.shape_cast %242 : vector<1x8x256xf32> to vector<8x256xf32>
    %c5_99 = arith.constant 5 : index
    %c1_100 = arith.constant 1 : index
    %244 = memref.load %arg3[%c5_99, %c1_100] : memref<8x4xf32, #tpu.memory_space<smem>>
    %245 = vector.broadcast %244 : f32 to vector<8x256xf32>
    %246 = arith.mulf %243, %245 : vector<8x256xf32>
    %247 = arith.addf %241, %246 : vector<8x256xf32>
    %248 = vector.extract_strided_slice %1 {offsets = [2, 0, 0], sizes = [1, 8, 256], strides = [1, 1, 1]} : vector<4x8x256xf32> to vector<1x8x256xf32>
    %249 = vector.shape_cast %248 : vector<1x8x256xf32> to vector<8x256xf32>
    %c5_101 = arith.constant 5 : index
    %c2_102 = arith.constant 2 : index
    %250 = memref.load %arg3[%c5_101, %c2_102] : memref<8x4xf32, #tpu.memory_space<smem>>
    %251 = vector.broadcast %250 : f32 to vector<8x256xf32>
    %252 = arith.mulf %249, %251 : vector<8x256xf32>
    %253 = arith.addf %247, %252 : vector<8x256xf32>
    %254 = vector.extract_strided_slice %1 {offsets = [3, 0, 0], sizes = [1, 8, 256], strides = [1, 1, 1]} : vector<4x8x256xf32> to vector<1x8x256xf32>
    %255 = vector.shape_cast %254 : vector<1x8x256xf32> to vector<8x256xf32>
    %c5_103 = arith.constant 5 : index
    %c3_104 = arith.constant 3 : index
    %256 = memref.load %arg3[%c5_103, %c3_104] : memref<8x4xf32, #tpu.memory_space<smem>>
    %257 = vector.broadcast %256 : f32 to vector<8x256xf32>
    %258 = arith.mulf %255, %257 : vector<8x256xf32>
    %259 = arith.addf %253, %258 : vector<8x256xf32>
    %c5_105 = arith.constant 5 : index
    %260 = memref.load %arg4[%c5_105] : memref<8xf32, #tpu.memory_space<smem>>
    %261 = vector.broadcast %260 : f32 to vector<8x256xf32>
    %262 = arith.addf %259, %261 : vector<8x256xf32>
    %cst_106 = arith.constant 0.000000e+00 : f32
    %263 = vector.broadcast %cst_106 : f32 to vector<8x256xf32>
    %264 = arith.maximumf %262, %263 : vector<8x256xf32>
    %c5_107 = arith.constant 5 : index
    %c0_108 = arith.constant 0 : index
    %265 = memref.load %arg5[%c5_107, %c0_108] : memref<8x5xf32, #tpu.memory_space<smem>>
    %266 = vector.broadcast %265 : f32 to vector<8x256xf32>
    %267 = arith.mulf %264, %266 : vector<8x256xf32>
    %268 = arith.addf %220, %267 : vector<8x256xf32>
    %c5_109 = arith.constant 5 : index
    %c1_110 = arith.constant 1 : index
    %269 = memref.load %arg5[%c5_109, %c1_110] : memref<8x5xf32, #tpu.memory_space<smem>>
    %270 = vector.broadcast %269 : f32 to vector<8x256xf32>
    %271 = arith.mulf %264, %270 : vector<8x256xf32>
    %272 = arith.addf %224, %271 : vector<8x256xf32>
    %c5_111 = arith.constant 5 : index
    %c2_112 = arith.constant 2 : index
    %273 = memref.load %arg5[%c5_111, %c2_112] : memref<8x5xf32, #tpu.memory_space<smem>>
    %274 = vector.broadcast %273 : f32 to vector<8x256xf32>
    %275 = arith.mulf %264, %274 : vector<8x256xf32>
    %276 = arith.addf %228, %275 : vector<8x256xf32>
    %c5_113 = arith.constant 5 : index
    %c3_114 = arith.constant 3 : index
    %277 = memref.load %arg5[%c5_113, %c3_114] : memref<8x5xf32, #tpu.memory_space<smem>>
    %278 = vector.broadcast %277 : f32 to vector<8x256xf32>
    %279 = arith.mulf %264, %278 : vector<8x256xf32>
    %280 = arith.addf %232, %279 : vector<8x256xf32>
    %c5_115 = arith.constant 5 : index
    %c4_116 = arith.constant 4 : index
    %281 = memref.load %arg5[%c5_115, %c4_116] : memref<8x5xf32, #tpu.memory_space<smem>>
    %282 = vector.broadcast %281 : f32 to vector<8x256xf32>
    %283 = arith.mulf %264, %282 : vector<8x256xf32>
    %284 = arith.addf %236, %283 : vector<8x256xf32>
    %285 = vector.extract_strided_slice %1 {offsets = [0, 0, 0], sizes = [1, 8, 256], strides = [1, 1, 1]} : vector<4x8x256xf32> to vector<1x8x256xf32>
    %286 = vector.shape_cast %285 : vector<1x8x256xf32> to vector<8x256xf32>
    %c6 = arith.constant 6 : index
    %c0_117 = arith.constant 0 : index
    %287 = memref.load %arg3[%c6, %c0_117] : memref<8x4xf32, #tpu.memory_space<smem>>
    %288 = vector.broadcast %287 : f32 to vector<8x256xf32>
    %289 = arith.mulf %286, %288 : vector<8x256xf32>
    %290 = vector.extract_strided_slice %1 {offsets = [1, 0, 0], sizes = [1, 8, 256], strides = [1, 1, 1]} : vector<4x8x256xf32> to vector<1x8x256xf32>
    %291 = vector.shape_cast %290 : vector<1x8x256xf32> to vector<8x256xf32>
    %c6_118 = arith.constant 6 : index
    %c1_119 = arith.constant 1 : index
    %292 = memref.load %arg3[%c6_118, %c1_119] : memref<8x4xf32, #tpu.memory_space<smem>>
    %293 = vector.broadcast %292 : f32 to vector<8x256xf32>
    %294 = arith.mulf %291, %293 : vector<8x256xf32>
    %295 = arith.addf %289, %294 : vector<8x256xf32>
    %296 = vector.extract_strided_slice %1 {offsets = [2, 0, 0], sizes = [1, 8, 256], strides = [1, 1, 1]} : vector<4x8x256xf32> to vector<1x8x256xf32>
    %297 = vector.shape_cast %296 : vector<1x8x256xf32> to vector<8x256xf32>
    %c6_120 = arith.constant 6 : index
    %c2_121 = arith.constant 2 : index
    %298 = memref.load %arg3[%c6_120, %c2_121] : memref<8x4xf32, #tpu.memory_space<smem>>
    %299 = vector.broadcast %298 : f32 to vector<8x256xf32>
    %300 = arith.mulf %297, %299 : vector<8x256xf32>
    %301 = arith.addf %295, %300 : vector<8x256xf32>
    %302 = vector.extract_strided_slice %1 {offsets = [3, 0, 0], sizes = [1, 8, 256], strides = [1, 1, 1]} : vector<4x8x256xf32> to vector<1x8x256xf32>
    %303 = vector.shape_cast %302 : vector<1x8x256xf32> to vector<8x256xf32>
    %c6_122 = arith.constant 6 : index
    %c3_123 = arith.constant 3 : index
    %304 = memref.load %arg3[%c6_122, %c3_123] : memref<8x4xf32, #tpu.memory_space<smem>>
    %305 = vector.broadcast %304 : f32 to vector<8x256xf32>
    %306 = arith.mulf %303, %305 : vector<8x256xf32>
    %307 = arith.addf %301, %306 : vector<8x256xf32>
    %c6_124 = arith.constant 6 : index
    %308 = memref.load %arg4[%c6_124] : memref<8xf32, #tpu.memory_space<smem>>
    %309 = vector.broadcast %308 : f32 to vector<8x256xf32>
    %310 = arith.addf %307, %309 : vector<8x256xf32>
    %cst_125 = arith.constant 0.000000e+00 : f32
    %311 = vector.broadcast %cst_125 : f32 to vector<8x256xf32>
    %312 = arith.maximumf %310, %311 : vector<8x256xf32>
    %c6_126 = arith.constant 6 : index
    %c0_127 = arith.constant 0 : index
    %313 = memref.load %arg5[%c6_126, %c0_127] : memref<8x5xf32, #tpu.memory_space<smem>>
    %314 = vector.broadcast %313 : f32 to vector<8x256xf32>
    %315 = arith.mulf %312, %314 : vector<8x256xf32>
    %316 = arith.addf %268, %315 : vector<8x256xf32>
    %c6_128 = arith.constant 6 : index
    %c1_129 = arith.constant 1 : index
    %317 = memref.load %arg5[%c6_128, %c1_129] : memref<8x5xf32, #tpu.memory_space<smem>>
    %318 = vector.broadcast %317 : f32 to vector<8x256xf32>
    %319 = arith.mulf %312, %318 : vector<8x256xf32>
    %320 = arith.addf %272, %319 : vector<8x256xf32>
    %c6_130 = arith.constant 6 : index
    %c2_131 = arith.constant 2 : index
    %321 = memref.load %arg5[%c6_130, %c2_131] : memref<8x5xf32, #tpu.memory_space<smem>>
    %322 = vector.broadcast %321 : f32 to vector<8x256xf32>
    %323 = arith.mulf %312, %322 : vector<8x256xf32>
    %324 = arith.addf %276, %323 : vector<8x256xf32>
    %c6_132 = arith.constant 6 : index
    %c3_133 = arith.constant 3 : index
    %325 = memref.load %arg5[%c6_132, %c3_133] : memref<8x5xf32, #tpu.memory_space<smem>>
    %326 = vector.broadcast %325 : f32 to vector<8x256xf32>
    %327 = arith.mulf %312, %326 : vector<8x256xf32>
    %328 = arith.addf %280, %327 : vector<8x256xf32>
    %c6_134 = arith.constant 6 : index
    %c4_135 = arith.constant 4 : index
    %329 = memref.load %arg5[%c6_134, %c4_135] : memref<8x5xf32, #tpu.memory_space<smem>>
    %330 = vector.broadcast %329 : f32 to vector<8x256xf32>
    %331 = arith.mulf %312, %330 : vector<8x256xf32>
    %332 = arith.addf %284, %331 : vector<8x256xf32>
    %333 = vector.extract_strided_slice %1 {offsets = [0, 0, 0], sizes = [1, 8, 256], strides = [1, 1, 1]} : vector<4x8x256xf32> to vector<1x8x256xf32>
    %334 = vector.shape_cast %333 : vector<1x8x256xf32> to vector<8x256xf32>
    %c7 = arith.constant 7 : index
    %c0_136 = arith.constant 0 : index
    %335 = memref.load %arg3[%c7, %c0_136] : memref<8x4xf32, #tpu.memory_space<smem>>
    %336 = vector.broadcast %335 : f32 to vector<8x256xf32>
    %337 = arith.mulf %334, %336 : vector<8x256xf32>
    %338 = vector.extract_strided_slice %1 {offsets = [1, 0, 0], sizes = [1, 8, 256], strides = [1, 1, 1]} : vector<4x8x256xf32> to vector<1x8x256xf32>
    %339 = vector.shape_cast %338 : vector<1x8x256xf32> to vector<8x256xf32>
    %c7_137 = arith.constant 7 : index
    %c1_138 = arith.constant 1 : index
    %340 = memref.load %arg3[%c7_137, %c1_138] : memref<8x4xf32, #tpu.memory_space<smem>>
    %341 = vector.broadcast %340 : f32 to vector<8x256xf32>
    %342 = arith.mulf %339, %341 : vector<8x256xf32>
    %343 = arith.addf %337, %342 : vector<8x256xf32>
    %344 = vector.extract_strided_slice %1 {offsets = [2, 0, 0], sizes = [1, 8, 256], strides = [1, 1, 1]} : vector<4x8x256xf32> to vector<1x8x256xf32>
    %345 = vector.shape_cast %344 : vector<1x8x256xf32> to vector<8x256xf32>
    %c7_139 = arith.constant 7 : index
    %c2_140 = arith.constant 2 : index
    %346 = memref.load %arg3[%c7_139, %c2_140] : memref<8x4xf32, #tpu.memory_space<smem>>
    %347 = vector.broadcast %346 : f32 to vector<8x256xf32>
    %348 = arith.mulf %345, %347 : vector<8x256xf32>
    %349 = arith.addf %343, %348 : vector<8x256xf32>
    %350 = vector.extract_strided_slice %1 {offsets = [3, 0, 0], sizes = [1, 8, 256], strides = [1, 1, 1]} : vector<4x8x256xf32> to vector<1x8x256xf32>
    %351 = vector.shape_cast %350 : vector<1x8x256xf32> to vector<8x256xf32>
    %c7_141 = arith.constant 7 : index
    %c3_142 = arith.constant 3 : index
    %352 = memref.load %arg3[%c7_141, %c3_142] : memref<8x4xf32, #tpu.memory_space<smem>>
    %353 = vector.broadcast %352 : f32 to vector<8x256xf32>
    %354 = arith.mulf %351, %353 : vector<8x256xf32>
    %355 = arith.addf %349, %354 : vector<8x256xf32>
    %c7_143 = arith.constant 7 : index
    %356 = memref.load %arg4[%c7_143] : memref<8xf32, #tpu.memory_space<smem>>
    %357 = vector.broadcast %356 : f32 to vector<8x256xf32>
    %358 = arith.addf %355, %357 : vector<8x256xf32>
    %cst_144 = arith.constant 0.000000e+00 : f32
    %359 = vector.broadcast %cst_144 : f32 to vector<8x256xf32>
    %360 = arith.maximumf %358, %359 : vector<8x256xf32>
    %c7_145 = arith.constant 7 : index
    %c0_146 = arith.constant 0 : index
    %361 = memref.load %arg5[%c7_145, %c0_146] : memref<8x5xf32, #tpu.memory_space<smem>>
    %362 = vector.broadcast %361 : f32 to vector<8x256xf32>
    %363 = arith.mulf %360, %362 : vector<8x256xf32>
    %364 = arith.addf %316, %363 : vector<8x256xf32>
    %c7_147 = arith.constant 7 : index
    %c1_148 = arith.constant 1 : index
    %365 = memref.load %arg5[%c7_147, %c1_148] : memref<8x5xf32, #tpu.memory_space<smem>>
    %366 = vector.broadcast %365 : f32 to vector<8x256xf32>
    %367 = arith.mulf %360, %366 : vector<8x256xf32>
    %368 = arith.addf %320, %367 : vector<8x256xf32>
    %c7_149 = arith.constant 7 : index
    %c2_150 = arith.constant 2 : index
    %369 = memref.load %arg5[%c7_149, %c2_150] : memref<8x5xf32, #tpu.memory_space<smem>>
    %370 = vector.broadcast %369 : f32 to vector<8x256xf32>
    %371 = arith.mulf %360, %370 : vector<8x256xf32>
    %372 = arith.addf %324, %371 : vector<8x256xf32>
    %c7_151 = arith.constant 7 : index
    %c3_152 = arith.constant 3 : index
    %373 = memref.load %arg5[%c7_151, %c3_152] : memref<8x5xf32, #tpu.memory_space<smem>>
    %374 = vector.broadcast %373 : f32 to vector<8x256xf32>
    %375 = arith.mulf %360, %374 : vector<8x256xf32>
    %376 = arith.addf %328, %375 : vector<8x256xf32>
    %c7_153 = arith.constant 7 : index
    %c4_154 = arith.constant 4 : index
    %377 = memref.load %arg5[%c7_153, %c4_154] : memref<8x5xf32, #tpu.memory_space<smem>>
    %378 = vector.broadcast %377 : f32 to vector<8x256xf32>
    %379 = arith.mulf %360, %378 : vector<8x256xf32>
    %380 = arith.addf %332, %379 : vector<8x256xf32>
    %c0_155 = arith.constant 0 : index
    %c0_156 = arith.constant 0 : index
    %381 = vector.load %arg8[%c0_155, %c0_156] : memref<8x256xf32, #tpu.memory_space<vmem>>, vector<8x256xf32>
    tpu.vector_store %arg8[%c0_155, %c0_156], %372 {strides = array<i32>} : memref<8x256xf32, #tpu.memory_space<vmem>>, vector<8x256xf32>,
    %c2_157 = arith.constant 2 : index
    %c0_158 = arith.constant 0 : index
    %382 = vector.load %arg8[%c2_157, %c0_158] : memref<8x256xf32, #tpu.memory_space<vmem>>, vector<6x256xf32>
    %383 = vector.extract_strided_slice %364 {offsets = [0, 0], sizes = [6, 256], strides = [1, 1]} : vector<8x256xf32> to vector<6x256xf32>
    %384 = arith.addf %382, %383 : vector<6x256xf32>
    %c2_159 = arith.constant 2 : index
    %c0_160 = arith.constant 0 : index
    %385 = vector.load %arg8[%c2_159, %c0_160] : memref<8x256xf32, #tpu.memory_space<vmem>>, vector<6x256xf32>
    tpu.vector_store %arg8[%c2_159, %c0_160], %384 {strides = array<i32>} : memref<8x256xf32, #tpu.memory_space<vmem>>, vector<6x256xf32>,
    %c1_161 = arith.constant 1 : index
    %c0_162 = arith.constant 0 : index
    %386 = vector.load %arg8[%c1_161, %c0_162] : memref<8x256xf32, #tpu.memory_space<vmem>>, vector<7x256xf32>
    %387 = vector.extract_strided_slice %368 {offsets = [0, 0], sizes = [7, 256], strides = [1, 1]} : vector<8x256xf32> to vector<7x256xf32>
    %388 = arith.addf %386, %387 : vector<7x256xf32>
    %c1_163 = arith.constant 1 : index
    %c0_164 = arith.constant 0 : index
    %389 = vector.load %arg8[%c1_163, %c0_164] : memref<8x256xf32, #tpu.memory_space<vmem>>, vector<7x256xf32>
    tpu.vector_store %arg8[%c1_163, %c0_164], %388 {strides = array<i32>} : memref<8x256xf32, #tpu.memory_space<vmem>>, vector<7x256xf32>,
    %c0_165 = arith.constant 0 : index
    %c0_166 = arith.constant 0 : index
    %390 = vector.load %arg8[%c0_165, %c0_166] : memref<8x256xf32, #tpu.memory_space<vmem>>, vector<7x256xf32>
    %391 = vector.extract_strided_slice %376 {offsets = [1, 0], sizes = [7, 256], strides = [1, 1]} : vector<8x256xf32> to vector<7x256xf32>
    %392 = arith.addf %390, %391 : vector<7x256xf32>
    %c0_167 = arith.constant 0 : index
    %c0_168 = arith.constant 0 : index
    %393 = vector.load %arg8[%c0_167, %c0_168] : memref<8x256xf32, #tpu.memory_space<vmem>>, vector<7x256xf32>
    tpu.vector_store %arg8[%c0_167, %c0_168], %392 {strides = array<i32>} : memref<8x256xf32, #tpu.memory_space<vmem>>, vector<7x256xf32>,
    %c0_169 = arith.constant 0 : index
    %c0_170 = arith.constant 0 : index
    %394 = vector.load %arg8[%c0_169, %c0_170] : memref<8x256xf32, #tpu.memory_space<vmem>>, vector<6x256xf32>
    %395 = vector.extract_strided_slice %380 {offsets = [2, 0], sizes = [6, 256], strides = [1, 1]} : vector<8x256xf32> to vector<6x256xf32>
    %396 = arith.addf %394, %395 : vector<6x256xf32>
    %c0_171 = arith.constant 0 : index
    %c0_172 = arith.constant 0 : index
    %397 = vector.load %arg8[%c0_171, %c0_172] : memref<8x256xf32, #tpu.memory_space<vmem>>, vector<6x256xf32>
    tpu.vector_store %arg8[%c0_171, %c0_172], %396 {strides = array<i32>} : memref<8x256xf32, #tpu.memory_space<vmem>>, vector<6x256xf32>,
    %c0_173 = arith.constant 0 : index
    %c0_174 = arith.constant 0 : index
    %398 = vector.load %arg8[%c0_173, %c0_174] : memref<8x256xf32, #tpu.memory_space<vmem>>, vector<8x256xf32>
    %399 = arith.negf %398 : vector<8x256xf32>
    %400 = math.exp %399 : vector<8x256xf32>
    %cst_175 = arith.constant 1.000000e+00 : f32
    %401 = vector.broadcast %cst_175 : f32 to vector<8x256xf32>
    %402 = arith.addf %401, %400 : vector<8x256xf32>
    %403 = arith.divf %401, %402 : vector<8x256xf32>
    %c0_176 = arith.constant 0 : index
    %c0_177 = arith.constant 0 : index
    %c0_178 = arith.constant 0 : index
    %404 = vector.load %arg7[%c0_176, %c0_177, %c0_178] : memref<1x8x256xf32, #tpu.memory_space<vmem>>, vector<1x8x256xf32>
    %405 = vector.shape_cast %404 : vector<1x8x256xf32> to vector<8x256xf32>
    %406 = vector.shape_cast %403 : vector<8x256xf32> to vector<1x8x256xf32>
    tpu.vector_store %arg7[%c0_176, %c0_177, %c0_178], %406 {strides = array<i32>} : memref<1x8x256xf32, #tpu.memory_space<vmem>>, vector<1x8x256xf32>,
    %407 = vector.shape_cast %403 : vector<8x256xf32> to vector<1x8x256xf32>
    %408 = vector.broadcast %407 : vector<1x8x256xf32> to vector<4x8x256xf32>
    %409 = arith.mulf %1, %408 : vector<4x8x256xf32>
    %c0_179 = arith.constant 0 : index
    %c0_180 = arith.constant 0 : index
    %c0_181 = arith.constant 0 : index
    %c0_182 = arith.constant 0 : index
    %410 = vector.load %arg6[%c0_179, %c0_180, %c0_181, %c0_182] : memref<1x4x8x256xf32, #tpu.memory_space<vmem>>, vector<1x4x8x256xf32>
    %411 = vector.shape_cast %410 : vector<1x4x8x256xf32> to vector<4x8x256xf32>
    %412 = vector.shape_cast %409 : vector<4x8x256xf32> to vector<1x4x8x256xf32>
    tpu.vector_store %arg6[%c0_179, %c0_180, %c0_181, %c0_182], %412 {strides = array<i32>} : memref<1x4x8x256xf32, #tpu.memory_space<vmem>>, vector<1x4x8x256xf32>,
    return
  }
  func.func @transform_0(%arg0: i32, %arg1: i32) -> (i32, i32, i32, i32) {
    %c0_i32 = arith.constant 0 : i32
    %c0_i32_0 = arith.constant 0 : i32
    %c0_i32_1 = arith.constant 0 : i32
    return %arg0, %c0_i32, %c0_i32_0, %arg1 : i32, i32, i32, i32
  }
  func.func @transform_1(%arg0: i32, %arg1: i32) -> (i32, i32) {
    %c0_i32 = arith.constant 0 : i32
    %c0_i32_0 = arith.constant 0 : i32
    %c0_i32_1 = arith.constant 0 : i32
    return %c0_i32, %c0_i32_0 : i32, i32
  }
  func.func @transform_2(%arg0: i32, %arg1: i32) -> i32 {
    %c0_i32 = arith.constant 0 : i32
    %c0_i32_0 = arith.constant 0 : i32
    return %c0_i32 : i32
  }
  func.func @transform_3(%arg0: i32, %arg1: i32) -> (i32, i32) {
    %c0_i32 = arith.constant 0 : i32
    %c0_i32_0 = arith.constant 0 : i32
    %c0_i32_1 = arith.constant 0 : i32
    return %c0_i32, %c0_i32_0 : i32, i32
  }
  func.func @transform_4(%arg0: i32, %arg1: i32) -> (i32, i32, i32, i32) {
    %c0_i32 = arith.constant 0 : i32
    %c0_i32_0 = arith.constant 0 : i32
    %c0_i32_1 = arith.constant 0 : i32
    return %arg0, %c0_i32, %c0_i32_0, %arg1 : i32, i32, i32, i32
  }
  func.func @transform_5(%arg0: i32, %arg1: i32) -> (i32, i32, i32) {
    %c0_i32 = arith.constant 0 : i32
    %c0_i32_0 = arith.constant 0 : i32
    return %arg0, %c0_i32, %arg1 : i32, i32, i32
  }
}

</mosaic_0001>

<bundles_post_ra>
// kernel: temporal_quality_module.1
= control target key start
LH: loop header
LB: loop body
LE: loop exit
PB: predicated region body
PF: predicated region fallthrough
CT: control target
= control target key end

     0   :  { %11 = vsyncpa [#allocation4], 0  ;;  %s1900_s0 = inlined_call_operand.vmem [shape: f32[2,4,8,256], index: 0, kind: input, shape index: {}]   ;;  %s1901_s1 = inlined_call_operand.vmem [shape: f32[8,4], index: 1, kind: input, shape index: {}]   ;;  %s1902_s2 = inlined_call_operand.vmem [shape: f32[8], index: 2, kind: input, shape index: {}]   ;;  %s1903_s3 = inlined_call_operand.vmem [shape: f32[8,5], index: 3, kind: input, shape index: {}]   ;;  %s1904_s4 = inlined_call_operand.vmem [shape: f32[2,4,8,256], index: 4, kind: output, shape index: {0}]   ;;  %s1905_s5 = inlined_call_operand.vmem [shape: f32[2,8,256], index: 5, kind: output, shape index: {1}]  }
   0x1   :  { %12 = vsyncpa [#allocation6], 0  ;;  %s1313_s18 = smov 0   ;;  %s1315_s19 = smov 0  }
   0x2   :  { %s1317_s20 = smov 0  }
   0x3 LB: > { %s206_s23 = sshll.u32 %s1902_s2, 4  ;;  %s1039_s24 = sadd.s32 4294967295, %s1278_s20   ;;  %s1278_s20 = sphi %s1317_s20, %s18_s20   ;;  %s1274_s19 = sphi %s1315_s19, %s1916_s19   ;;  %s1270_s18 = sphi %s1313_s18, %s1915_s18   ;;  %s207_s23 = int_to_ptr.vmem [resolvable:$true] %s206_s23 }
   0x4   : > { %p1041_p0 = scmp.ge.s32.totalorder %s1278_s20, 1  ;;  %p182_p1 = scmp.lt.s32.totalorder %s1278_s20, 3 }
   0x5   : > { %p1334_p2 = scmp.eq.s32.totalorder %s1039_s24, 0  ;;  %s30_s27 = sadd.s32 1, %s1274_s19 }
   0x6   : > { %p1338_p3 = pnand %p1041_p0, %p182_p1  ;;  %s195_s30 = sshll.u32 %s1901_s1, 4  ;;  %s196_s30 = int_to_ptr.vmem [resolvable:$true] %s195_s30 }
   0x7   : > { %s1909_s25 = scalar_select %p1334_p2, 1, 0 }
   0x8   : > { %s1910_s26 = scalar_select %p1338_p3, 1, 0 }
   0x9   : > { %p1152_p4 = pneg %p1338_p3  ;;  %p1354_p6 = scmp.ge.s32.totalorder %s30_s27, 2 }
   0xa   : > { %s217_s10 = sshll.u32 %s1903_s3, 4  ;;  %s1203_s11 = scalar_lea.vmem %s207_s23, 16  ;;  %s218_s10 = int_to_ptr.vmem [resolvable:$true] %s217_s10 }
   0xb   : > { %p1350_p5 = pnand %p1334_p2, %p1152_p4  ;;  %p1204_p7 = scmp.ne.s32.totalorder %s207_s23, %s1203_s11 }
   0xc   : > { %p1211_p11 = scmp.lt.s32.totalorder %s207_s23, %s207_s23  ;;  %p1212_p12 = scmp.lt.s32.totalorder %s1203_s11, %s1203_s11 }
   0xd   : > { %p1205_p8 = pneg %p1350_p5 }
   0xe   : > { %p1213_p13 = por %p1212_p12, %p1211_p11 }
   0xf   : > { %p1206_p9 = pnand %p1205_p8, %p1204_p7 }
  0x11   : > { %p1207_p10 = pneg %p1206_p9 }
  0x13   : > { %p1214_p0 = pnand %p1213_p13, %p1207_p10 }
  0x15   : > { %1217 = shalt.err (!%p1214_p0)
}
  0x16   : > { %s1280_s12 = smov [#allocation5]   ;;  %s1918_s27 = smov (%p1354_p6, %s30_s27), 0 }
  0x17   : > { %1158 = dma.vmem_to_smem (!%p1350_p5), %s207_s23, 16, %s1280_s12, [#allocation6]  }
  0x18   : > { %s1218_s13 = scalar_lea.vmem %s196_s30, 128  ;;  %p1226_p9 = scmp.lt.s32.totalorder %s196_s30, %s196_s30 }
  0x19   : > { %p1219_p1 = scmp.ne.s32.totalorder %s196_s30, %s1218_s13  ;;  %p1227_p2 = scmp.lt.s32.totalorder %s1218_s13, %s1218_s13 }
  0x1b   : > { %p1221_p4 = pnand %p1219_p1, %p1205_p8  ;;  %p1228_p11 = por %p1227_p2, %p1226_p9 }
  0x1d   : > { %p1222_p7 = pneg %p1221_p4 }
  0x1f   : > { %p1229_p10 = pnand %p1228_p11, %p1222_p7 }
  0x21   : > { %1232 = shalt.err (!%p1229_p10)
}
  0x22   : > { %s1281_s14 = smov [#allocation3]   ;;  %s1233_s15 = scalar_lea.vmem %s218_s10, 128 }
  0x23   : > { %1155 = dma.vmem_to_smem (!%p1350_p5), %s196_s30, 128, %s1281_s14, [#allocation4]  }
  0x24   : > { %p1234_p6 = scmp.ne.s32.totalorder %s218_s10, %s1233_s15  ;;  %p1241_p0 = scmp.lt.s32.totalorder %s218_s10, %s218_s10 }
  0x25   : > { %p1242_p1 = scmp.lt.s32.totalorder %s1233_s15, %s1233_s15 }
  0x26   : > { %p1236_p12 = pnand %p1234_p6, %p1205_p8 }
  0x27   : > { %p1243_p4 = por %p1242_p1, %p1241_p0 }
  0x28   : > { %p1237_p13 = pneg %p1236_p12 }
  0x2a   : > { %p1244_p3 = pnand %p1243_p4, %p1237_p13 }
  0x2c   : > { %1247 = shalt.err (!%p1244_p3)
}
  0x2d   : > { %s1282_s16 = smov [#allocation7]   ;;  %p1913_p2 = scmp.ne.s32.totalorder %s1910_s26, 0 }
  0x2e   : > { %1161 = dma.vmem_to_smem (!%p1350_p5), %s218_s10, 128, %s1282_s16, [#allocation6]  }
  0x2f   : > { %243 = sbr.rel (%p1913_p2) target bundleno = 219 (0xdb), region = 36  ;;  %p1914_p7 = scmp.ne.s32.totalorder (!%p1913_p2), %s1909_s25, 0 }
  0x34   : > { %1261 = dma.done.wait (%p1914_p7), [#allocation4], 128  }
  0x35   : > { %1263 = vsyncadd (%p1914_p7), [#allocation4], 4294967168 }
  0x36   : > { %1265 = dma.done.wait (%p1914_p7), [#allocation6], 144  }
  0x37   : > { %1267 = vsyncadd (%p1914_p7), [#allocation6], 4294967152 }
  0x38   : > { %257 = sfence }
  0x39   : > { %p298_p3 = scmp.lt.s32.totalorder %s1270_s18, 1  ;;  %s335_s17 = sld [smem:[#allocation3]] }
  0x3a   : > { %s1056_s21 = sld [smem:[#allocation3 + $0x1]] }
  0x3b   : > { %s1920_s18 = smov (!%p298_p3, %s1270_s18), 1  ;;  %s1396_s22 = sld [smem:[#allocation3 + $0x2]] }
  0x3c   : > { %s1137_s23 = sshll.u32 %s1920_s18, 6  ;;  %s1058_s24 = sld [smem:[#allocation3 + $0x3]] }
  0x3d   : > { %s305_s25 = scalar_lea.vmem %s1900_s0, %s1137_s23  ;;  %s1404_s29 = sld [smem:[#allocation5]] }
  0x3e   : > { %v1406_v0 = vld [vmem:[%s305_s25] sm:$0xff]  ;;  %v1408_v1 = vld [vmem:[%s305_s25 + $0x10] sm:$0xff]  ;;  %s1410_s30 = sld [smem:[#allocation7 + $0x2]]  ;;  %v1417_v6 = vld [vmem:[%s305_s25 + $0x8] sm:$0xff] }
  0x3f   : > { %v336_v2 = vstv %s335_s17  ;;  %v1412_v3 = vld [vmem:[%s305_s25 + $0x20] sm:$0xff]  ;;  %s1415_s6 = sld [smem:[#allocation3 + $0x80]]  ;;  %v1419_v7 = vld [vmem:[%s305_s25 + $0x18] sm:$0xff]  ;;  %v1421_v8 = vld [vmem:[%s305_s25 + $0x30] sm:$0xff] }
  0x40   : > { %v337_v4 = vmul.f32 %v336_v2, %v1406_v0  ;;  %v340_v5 = vstv %s1056_s21  ;;  %s1424_s7 = sld [smem:[#allocation3 + $0x81]]  ;;  %v1426_v10 = vld [vmem:[%s305_s25 + $0x28] sm:$0xff]  ;;  %v1428_v11 = vld [vmem:[%s305_s25 + $0x38] sm:$0xff]  ;;  %v338_v12 = vmul.f32 %v336_v2, %v1417_v6 }
  0x41   : > { %v341_v9 = vmul.f32 %v340_v5, %v1408_v1  ;;  %v342_v13 = vmul.f32 %v340_v5, %v1419_v7  ;;  %v346_v14 = vstv %s1396_s22  ;;  %s1065_s8 = sld [smem:[#allocation3 + $0x82]] }
  0x42   : > { %v347_v16 = vmul.f32 %v346_v14, %v1412_v3  ;;  %v352_v17 = vstv %s1058_s24  ;;  %s1434_s9 = sld [smem:[#allocation3 + $0x83]]  ;;  %v348_v20 = vmul.f32 %v346_v14, %v1426_v10 }
  0x43   : > { %v343_v15 = vadd.f32 %v341_v9, %v337_v4  ;;  %v344_v18 = vadd.f32 %v342_v13, %v338_v12  ;;  %v353_v19 = vmul.f32 %v352_v17, %v1421_v8  ;;  %s1437_s10 = sld [smem:[#allocation5 + $0x1]]  ;;  %v354_v21 = vmul.f32 %v352_v17, %v1428_v11 }
  0x44   : > { %s1441_s11 = sld [smem:[#allocation7 + $0x82]]  ;;  %v358_v23 = vstv %s1404_s29  ;;  %v372_v38 = vstv %s1410_s30 }
  0x45   : > { %v349_v22 = vadd.f32 %v347_v16, %v343_v15  ;;  %v384_v24 = vstv %s1415_s6  ;;  %s1445_s12 = sld [smem:[#allocation3 + $0x100]]  ;;  %v350_v25 = vadd.f32 %v348_v20, %v344_v18 }
  0x46   : > { %v385_v27 = vmul.f32 %v384_v24, %v1406_v0  ;;  %v388_v28 = vstv %s1424_s7  ;;  %s1449_s13 = sld [smem:[#allocation3 + $0x101]]  ;;  %v386_v29 = vmul.f32 %v384_v24, %v1417_v6 }
  0x47   : > { %v355_v26 = vadd.f32 %v353_v19, %v349_v22  ;;  %v389_v30 = vmul.f32 %v388_v28, %v1408_v1  ;;  %v394_v31 = vstv %s1065_s8  ;;  %s1453_s14 = sld [smem:[#allocation3 + $0x102]]  ;;  %v356_v32 = vadd.f32 %v354_v21, %v350_v25 }
  0x48   : > { %v390_v33 = vmul.f32 %v388_v28, %v1419_v7  ;;  %v395_v35 = vmul.f32 %v394_v31, %v1412_v3  ;;  %v400_v36 = vstv %s1434_s9  ;;  %s1458_s15 = sld [smem:[#allocation3 + $0x103]]  ;;  %v396_v37 = vmul.f32 %v394_v31, %v1426_v10 }
  0x49   : > { %v359_v34 = vadd.f32 %v358_v23, %v355_v26  ;;  %v391_v39 = vadd.f32 %v389_v30, %v385_v27  ;;  %v401_v40 = vmul.f32 %v400_v36, %v1421_v8  ;;  %s1463_s16 = sld [smem:[#allocation5 + $0x2]]  ;;  %v360_v41 = vadd.f32 %v358_v23, %v356_v32 }
  0x4a   : > { %v406_v43 = vstv %s1437_s10  ;;  %s1468_s17 = sld [smem:[#allocation7 + $0x102]]  ;;  %v392_v44 = vadd.f32 %v390_v33, %v386_v29  ;;  %v402_v45 = vmul.f32 %v400_v36, %v1428_v11  ;;  %v424_v47 = vstv %s1441_s11 }
  0x4b   : > { %v1465_v42 = vmax.f32 %v359_v34, 0.0  ;;  %v397_v46 = vadd.f32 %v395_v35, %v391_v39  ;;  %v442_v48 = vstv %s1445_s12  ;;  %s1473_s21 = sld [smem:[#allocation3 + $0x180]]  ;;  %v1475_v49 = vmax.f32 %v360_v41, 0.0 }
  0x4c   : > { %v443_v51 = vmul.f32 %v442_v48, %v1406_v0  ;;  %v446_v52 = vstv %s1449_s13  ;;  %s1480_s22 = sld [smem:[#allocation3 + $0x181]]  ;;  %v398_v53 = vadd.f32 %v396_v37, %v392_v44  ;;  %v444_v61 = vmul.f32 %v442_v48, %v1417_v6 }
  0x4d   : > { %v373_v50 = vmul.f32 %v372_v38, %v1465_v42  ;;  %v403_v54 = vadd.f32 %v401_v40, %v397_v46  ;;  %v447_v55 = vmul.f32 %v446_v52, %v1408_v1  ;;  %v452_v56 = vstv %s1453_s14  ;;  %s1484_s24 = sld [smem:[#allocation3 + $0x182]] }
  0x4e   : > { %v374_v57 = vmul.f32 %v372_v38, %v1475_v49  ;;  %v453_v58 = vmul.f32 %v452_v56, %v1412_v3  ;;  %v458_v59 = vstv %s1458_s15  ;;  %s1489_s26 = sld [smem:[#allocation3 + $0x183]]  ;;  %v404_v60 = vadd.f32 %v402_v45, %v398_v53 }
  0x4f   : > { %v407_v62 = vadd.f32 %v406_v43, %v403_v54  ;;  %v449_v63 = vadd.f32 %v447_v55, %v443_v51  ;;  %v459_v2 = vmul.f32 %v458_v59, %v1421_v8  ;;  %v464_v4 = vstv %s1463_s16  ;;  %s1494_s28 = sld [smem:[#allocation5 + $0x3]] }
  0x50   : > { %v482_v5 = vstv %s1468_s17  ;;  %s1497_s25 = sld [smem:[#allocation7 + $0x182]]  ;;  %v408_v9 = vadd.f32 %v406_v43, %v404_v60  ;;  %v448_v12 = vmul.f32 %v446_v52, %v1419_v7  ;;  %v454_v13 = vmul.f32 %v452_v56, %v1426_v10 }
  0x51   : > { %v1501_v14 = vmax.f32 %v407_v62, 0.0  ;;  %v455_v15 = vadd.f32 %v453_v58, %v449_v63  ;;  %v500_v16 = vstv %s1473_s21  ;;  %s1504_s29 = sld [smem:[#allocation3 + $0x200]]  ;;  %v460_v17 = vmul.f32 %v458_v59, %v1428_v11 }
  0x52   : > { %v501_v18 = vmul.f32 %v500_v16, %v1406_v0  ;;  %v504_v19 = vstv %s1480_s22  ;;  %s1509_s30 = sld [smem:[#allocation3 + $0x201]]  ;;  %v1511_v20 = vmax.f32 %v408_v9, 0.0  ;;  %v450_v21 = vadd.f32 %v448_v12, %v444_v61 }
  0x53   : > { %v425_v22 = vmul.f32 %v424_v47, %v1501_v14  ;;  %v461_v23 = vadd.f32 %v459_v2, %v455_v15  ;;  %v505_v24 = vmul.f32 %v504_v19, %v1408_v1  ;;  %v510_v25 = vstv %s1484_s24  ;;  %s1516_s6 = sld [smem:[#allocation3 + $0x202]] }
  0x54   : > { %v511_v26 = vmul.f32 %v510_v25, %v1412_v3  ;;  %v516_v27 = vstv %s1489_s26  ;;  %s1520_s7 = sld [smem:[#allocation3 + $0x203]]  ;;  %v426_v28 = vmul.f32 %v424_v47, %v1511_v20  ;;  %v456_v29 = vadd.f32 %v454_v13, %v450_v21 }
  0x55   : > { %v427_v30 = vadd.f32 %v425_v22, %v373_v50  ;;  %v465_v31 = vadd.f32 %v464_v4, %v461_v23  ;;  %v507_v32 = vadd.f32 %v505_v24, %v501_v18  ;;  %v517_v33 = vmul.f32 %v516_v27, %v1421_v8  ;;  %s1524_s8 = sld [smem:[#allocation5 + $0x4]] }
  0x56   : > { %v522_v34 = vstv %s1494_s28  ;;  %v540_v35 = vstv %s1497_s25  ;;  %s1528_s9 = sld [smem:[#allocation7 + $0x202]]  ;;  %v428_v36 = vadd.f32 %v426_v28, %v374_v57  ;;  %v462_v37 = vadd.f32 %v460_v17, %v456_v29 }
  0x57   : > { %v1530_v38 = vmax.f32 %v465_v31, 0.0  ;;  %v513_v39 = vadd.f32 %v511_v26, %v507_v32  ;;  %v558_v40 = vstv %s1504_s29  ;;  %s1533_s10 = sld [smem:[#allocation3 + $0x280]]  ;;  %v502_v41 = vmul.f32 %v500_v16, %v1417_v6 }
  0x58   : > { %v559_v43 = vmul.f32 %v558_v40, %v1406_v0  ;;  %v562_v44 = vstv %s1509_s30  ;;  %s1538_s11 = sld [smem:[#allocation3 + $0x281]]  ;;  %v466_v45 = vadd.f32 %v464_v4, %v462_v37  ;;  %v506_v46 = vmul.f32 %v504_v19, %v1419_v7 }
  0x59   : > { %v483_v47 = vmul.f32 %v482_v5, %v1530_v38  ;;  %v519_v48 = vadd.f32 %v517_v33, %v513_v39  ;;  %v563_v50 = vmul.f32 %v562_v44, %v1408_v1  ;;  %v568_v51 = vstv %s1516_s6  ;;  %s1546_s12 = sld [smem:[#allocation3 + $0x282]] }
  0x5a   : > { %v569_v52 = vmul.f32 %v568_v51, %v1412_v3  ;;  %v574_v53 = vstv %s1520_s7  ;;  %s1550_s13 = sld [smem:[#allocation3 + $0x283]]  ;;  %v1552_v54 = vmax.f32 %v466_v45, 0.0  ;;  %v508_v55 = vadd.f32 %v506_v46, %v502_v41 }
  0x5b   : > { %v485_v56 = vadd.f32 %v483_v47, %v427_v30  ;;  %v523_v57 = vadd.f32 %v522_v34, %v519_v48  ;;  %v565_v58 = vadd.f32 %v563_v50, %v559_v43  ;;  %v575_v59 = vmul.f32 %v574_v53, %v1421_v8  ;;  %s1559_s14 = sld [smem:[#allocation5 + $0x5]] }
  0x5c   : > { %v580_v60 = vstv %s1524_s8  ;;  %v598_v61 = vstv %s1528_s9  ;;  %s1563_s15 = sld [smem:[#allocation7 + $0x282]]  ;;  %v484_v62 = vmul.f32 %v482_v5, %v1552_v54  ;;  %v512_v63 = vmul.f32 %v510_v25, %v1426_v10 }
  0x5d   : > { %v1569_v2 = vmax.f32 %v523_v57, 0.0  ;;  %v571_v4 = vadd.f32 %v569_v52, %v565_v58  ;;  %v616_v9 = vstv %s1533_s10  ;;  %s1572_s16 = sld [smem:[#allocation3 + $0x300]]  ;;  %v518_v12 = vmul.f32 %v516_v27, %v1428_v11 }
  0x5e   : > { %v617_v13 = vmul.f32 %v616_v9, %v1406_v0  ;;  %v620_v15 = vstv %s1538_s11  ;;  %s1577_s21 = sld [smem:[#allocation3 + $0x301]]  ;;  %v486_v5 = vadd.f32 %v484_v62, %v428_v36  ;;  %v514_v16 = vadd.f32 %v512_v63, %v508_v55 }
  0x5f   : > { %v541_v17 = vmul.f32 %v540_v35, %v1569_v2  ;;  %v577_v18 = vadd.f32 %v575_v59, %v571_v4  ;;  %v621_v19 = vmul.f32 %v620_v15, %v1408_v1  ;;  %v626_v21 = vstv %s1546_s12  ;;  %s1584_s17 = sld [smem:[#allocation3 + $0x302]] }
  0x60   : > { %v627_v22 = vmul.f32 %v626_v21, %v1412_v3  ;;  %v632_v23 = vstv %s1550_s13  ;;  %s1590_s22 = sld [smem:[#allocation3 + $0x303]]  ;;  %v520_v24 = vadd.f32 %v518_v12, %v514_v16  ;;  %v560_v25 = vmul.f32 %v558_v40, %v1417_v6 }
  0x61   : > { %v543_v26 = vadd.f32 %v541_v17, %v485_v56  ;;  %v581_v27 = vadd.f32 %v580_v60, %v577_v18  ;;  %v623_v28 = vadd.f32 %v621_v19, %v617_v13  ;;  %v633_v29 = vmul.f32 %v632_v23, %v1421_v8  ;;  %s1598_s24 = sld [smem:[#allocation5 + $0x6]] }
  0x62   : > { %v638_v30 = vstv %s1559_s14  ;;  %v656_v31 = vstv %s1563_s15  ;;  %s1602_s26 = sld [smem:[#allocation7 + $0x302]]  ;;  %v524_v32 = vadd.f32 %v522_v34, %v520_v24  ;;  %v564_v33 = vmul.f32 %v562_v44, %v1419_v7 }
  0x63   : > { %v1607_v36 = vmax.f32 %v581_v27, 0.0  ;;  %v629_v37 = vadd.f32 %v627_v22, %v623_v28  ;;  %v674_v39 = vstv %s1572_s16  ;;  %s1610_s29 = sld [smem:[#allocation3 + $0x380]]  ;;  %v570_v40 = vmul.f32 %v568_v51, %v1426_v10 }
  0x64   : > { %v675_v41 = vmul.f32 %v674_v39, %v1406_v0  ;;  %v678_v43 = vstv %s1577_s21  ;;  %s1615_s30 = sld [smem:[#allocation3 + $0x381]]  ;;  %v1617_v45 = vmax.f32 %v524_v32, 0.0  ;;  %v566_v34 = vadd.f32 %v564_v33, %v560_v25 }
  0x65   : > { %v599_v44 = vmul.f32 %v598_v61, %v1607_v36  ;;  %v635_v46 = vadd.f32 %v633_v29, %v629_v37  ;;  %v679_v47 = vmul.f32 %v678_v43, %v1408_v1  ;;  %v684_v48 = vstv %s1584_s17  ;;  %s1624_s28 = sld [smem:[#allocation3 + $0x382]] }
  0x66   : > { %v685_v50 = vmul.f32 %v684_v48, %v1412_v3  ;;  %v690_v51 = vstv %s1590_s22  ;;  %s1628_s6 = sld [smem:[#allocation3 + $0x383]]  ;;  %v542_v52 = vmul.f32 %v540_v35, %v1617_v45  ;;  %v572_v55 = vadd.f32 %v570_v40, %v566_v34 }
  0x67   : > { %v601_v56 = vadd.f32 %v599_v44, %v543_v26  ;;  %v639_v57 = vadd.f32 %v638_v30, %v635_v46  ;;  %v681_v58 = vadd.f32 %v679_v47, %v675_v41  ;;  %v691_v59 = vmul.f32 %v690_v51, %v1421_v8  ;;  %s1636_s10 = sld [smem:[#allocation5 + $0x7]] }
  0x68   : > { %v696_v62 = vstv %s1598_s24  ;;  %v714_v63 = vstv %s1602_s26  ;;  %s1640_s11 = sld [smem:[#allocation7 + $0x382]]  ;;  %v544_v4 = vadd.f32 %v542_v52, %v486_v5  ;;  %v576_v35 = vmul.f32 %v574_v53, %v1428_v11 }
  0x69   : > { %v1645_v12 = vmax.f32 %v639_v57, 0.0  ;;  %v687_v13 = vadd.f32 %v685_v50, %v681_v58  ;;  %v732_v16 = vstv %s1610_s29  ;;  %v618_v17 = vmul.f32 %v616_v9, %v1417_v6  ;;  %s1657_s25 = sld [smem:[#allocation7]] }
  0x6a   : > { %v733_v18 = vmul.f32 %v732_v16, %v1406_v0  ;;  %v736_v19 = vstv %s1615_s30  ;;  %v578_v22 = vadd.f32 %v576_v35, %v572_v55  ;;  %v622_v24 = vmul.f32 %v620_v15, %v1419_v7  ;;  %s1663_s7 = sld [smem:[#allocation7 + $0x80]] }
  0x6b   : > { %v657_v5 = vmul.f32 %v656_v31, %v1645_v12  ;;  %v693_v53 = vadd.f32 %v691_v59, %v687_v13  ;;  %v737_v25 = vmul.f32 %v736_v19, %v1408_v1  ;;  %v742_v26 = vstv %s1624_s28  ;;  %s1668_s16 = sld [smem:[#allocation7 + $0x100]] }
  0x6c   : > { %v743_v9 = vmul.f32 %v742_v26, %v1412_v3  ;;  %v748_v27 = vstv %s1628_s6  ;;  %v582_v28 = vadd.f32 %v580_v60, %v578_v22  ;;  %v624_v29 = vadd.f32 %v622_v24, %v618_v17  ;;  %s1677_s8 = sld [smem:[#allocation7 + $0x180]] }
  0x6d   : > { %v659_v15 = vadd.f32 %v657_v5, %v601_v56  ;;  %v697_v32 = vadd.f32 %v696_v62, %v693_v53  ;;  %v739_v33 = vadd.f32 %v737_v25, %v733_v18  ;;  %v749_v37 = vmul.f32 %v748_v27, %v1421_v8  ;;  %s1685_s21 = sld [smem:[#allocation7 + $0x200]] }
  0x6e   : > { %v754_v40 = vstv %s1636_s10  ;;  %v772_v41 = vstv %s1640_s11  ;;  %v1672_v34 = vmax.f32 %v582_v28, 0.0  ;;  %v628_v60 = vmul.f32 %v626_v21, %v1426_v10  ;;  %s1697_s12 = sld [smem:[#allocation7 + $0x280]] }
  0x6f   : > { %v1679_v44 = vmax.f32 %v697_v32, 0.0  ;;  %v745_v46 = vadd.f32 %v743_v9, %v739_v33  ;;  %v634_v47 = vmul.f32 %v632_v23, %v1428_v11  ;;  %v676_v50 = vmul.f32 %v674_v39, %v1417_v6  ;;  %s1700_s9 = sld [smem:[#allocation7 + $0x300]] }
  0x70   : > { %v600_v52 = vmul.f32 %v598_v61, %v1672_v34  ;;  %v630_v55 = vadd.f32 %v628_v60, %v624_v29  ;;  %v680_v56 = vmul.f32 %v678_v43, %v1419_v7  ;;  %v686_v21 = vmul.f32 %v684_v48, %v1426_v10  ;;  %s1704_s13 = sld [smem:[#allocation7 + $0x380]] }
  0x71   : > { %v715_v57 = vmul.f32 %v714_v63, %v1679_v44  ;;  %v751_v58 = vadd.f32 %v749_v37, %v745_v46  ;;  %v692_v59 = vmul.f32 %v690_v51, %v1428_v11  ;;  %v734_v23 = vmul.f32 %v732_v16, %v1417_v6  ;;  %s1717_s14 = sld [smem:[#allocation7 + $0x1]] }
  0x72   : > { %v602_v39 = vadd.f32 %v600_v52, %v544_v4  ;;  %v636_v61 = vadd.f32 %v634_v47, %v630_v55  ;;  %v682_v35 = vadd.f32 %v680_v56, %v676_v50  ;;  %v738_v43 = vmul.f32 %v736_v19, %v1419_v7  ;;  %s1725_s17 = sld [smem:[#allocation7 + $0x81]] }
  0x73   : > { %v717_v48 = vadd.f32 %v715_v57, %v659_v15  ;;  %v755_v13 = vadd.f32 %v754_v40, %v751_v58  ;;  %v744_v17 = vmul.f32 %v742_v26, %v1426_v10  ;;  %v750_v51 = vmul.f32 %v748_v27, %v1428_v11  ;;  %s1732_s22 = sld [smem:[#allocation7 + $0x101]] }
  0x74   : > { %v640_v4 = vadd.f32 %v638_v30, %v636_v61  ;;  %v688_v16 = vadd.f32 %v686_v21, %v682_v35  ;;  %v740_v18 = vadd.f32 %v738_v43, %v734_v23  ;;  %v364_v22 = vstv %s1657_s25  ;;  %s1737_s29 = sld [smem:[#allocation7 + $0x181]] }
  0x75   : > { %v1709_v19 = vmax.f32 %v755_v13, 0.0  ;;  %v365_v24 = vmul.f32 %v364_v22, %v1465_v42  ;;  %v412_v5 = vstv %s1663_s7  ;;  %v470_v53 = vstv %s1668_s16  ;;  %s1741_s15 = sld [smem:[#allocation7 + $0x201]] }
  0x76   : > { %v1714_v25 = vmax.f32 %v640_v4, 0.0  ;;  %v694_v26 = vadd.f32 %v692_v59, %v688_v16  ;;  %v746_v9 = vadd.f32 %v744_v17, %v740_v18  ;;  %v413_v27 = vmul.f32 %v412_v5, %v1501_v14  ;;  %s1746_s24 = sld [smem:[#allocation7 + $0x281]] }
  0x77   : > { %v773_v30 = vmul.f32 %v772_v41, %v1709_v19  ;;  %v471_v28 = vmul.f32 %v470_v53, %v1530_v38  ;;  %v528_v29 = vstv %s1677_s8  ;;  %v586_v15 = vstv %s1685_s21  ;;  %s1754_s30 = sld [smem:[#allocation7 + $0x301]] }
  0x78   : > { %v658_v32 = vmul.f32 %v656_v31, %v1714_v25  ;;  %v698_v33 = vadd.f32 %v696_v62, %v694_v26  ;;  %v752_v37 = vadd.f32 %v750_v51, %v746_v9  ;;  %v415_v60 = vadd.f32 %v413_v27, %v365_v24  ;;  %s1759_s28 = sld [smem:[#allocation7 + $0x381]] }
  0x79   : > { %v775_v46 = vadd.f32 %v773_v30, %v717_v48  ;;  %v529_v47 = vmul.f32 %v528_v29, %v1569_v2  ;;  %v587_v50 = vmul.f32 %v586_v15, %v1607_v36  ;;  %v644_v52 = vstv %s1697_s12  ;;  %s1770_s26 = sld [smem:[#allocation7 + $0x3]] }
  0x7a   : > { %v660_v55 = vadd.f32 %v658_v32, %v602_v39  ;;  %v1739_v56 = vmax.f32 %v698_v33, 0.0  ;;  %v756_v31 = vadd.f32 %v754_v40, %v752_v37  ;;  %v473_v21 = vadd.f32 %v471_v28, %v415_v60  ;;  %s1775_s6 = sld [smem:[#allocation7 + $0x83]] }
  0x7b   : > { %789 = vst [vmem:[#allocation2] sm:$0xff] %v775_v46  ;;  %v702_v62 = vstv %s1700_s9  ;;  %v760_v57 = vstv %s1704_s13  ;;  %v366_v58 = vmul.f32 %v364_v22, %v1475_v49  ;;  %v645_v61 = vmul.f32 %v644_v52, %v1645_v12  ;;  %s1780_s10 = sld [smem:[#allocation7 + $0x103]] }
  0x7c   : > { %v716_v59 = vmul.f32 %v714_v63, %v1739_v56  ;;  %v1751_v23 = vmax.f32 %v756_v31, 0.0  ;;  %v531_v39 = vadd.f32 %v529_v47, %v473_v21  ;;  %v703_v40 = vmul.f32 %v702_v62, %v1679_v44  ;;  %s1784_s11 = sld [smem:[#allocation7 + $0x183]] }
  0x7d   : > { %v414_v35 = vmul.f32 %v412_v5, %v1511_v20  ;;  %v472_v43 = vmul.f32 %v470_v53, %v1552_v54  ;;  %v761_v17 = vmul.f32 %v760_v57, %v1709_v19  ;;  %v530_v4 = vmul.f32 %v528_v29, %v1617_v45  ;;  %s1789_s25 = sld [smem:[#allocation7 + $0x203]] }
  0x7e   : > { %v718_v48 = vadd.f32 %v716_v59, %v660_v55  ;;  %v774_v63 = vmul.f32 %v772_v41, %v1751_v23  ;;  %v589_v13 = vadd.f32 %v587_v50, %v531_v39  ;;  %v588_v16 = vmul.f32 %v586_v15, %v1672_v34  ;;  %s1796_s7 = sld [smem:[#allocation7 + $0x283]] }
  0x7f   : > { %v416_v51 = vadd.f32 %v414_v35, %v366_v58  ;;  %v646_v18 = vmul.f32 %v644_v52, %v1714_v25  ;;  %v368_v5 = vstv %s1717_s14  ;;  %v418_v53 = vstv %s1725_s17  ;;  %s1800_s16 = sld [smem:[#allocation7 + $0x303]] }
  0x80   : > { %v776_v22 = vadd.f32 %v774_v63, %v718_v48  ;;  %v647_v24 = vadd.f32 %v645_v61, %v589_v13  ;;  %v369_v41 = vmul.f32 %v368_v5, %v1465_v42  ;;  %v419_v9 = vmul.f32 %v418_v53, %v1501_v14  ;;  %s1806_s8 = sld [smem:[#allocation7 + $0x383]] }
  0x81   : > { %v474_v26 = vadd.f32 %v472_v43, %v416_v51  ;;  %v476_v27 = vstv %s1732_s22  ;;  %v534_v29 = vstv %s1737_s29  ;;  %v592_v15 = vstv %s1741_s15  ;;  %s1813_s21 = sld [smem:[#allocation7 + $0x4]]  ;;  %s1139_s15 = sshll.u32 %s1920_s18, 4 }
  0x82   : > { %790 = vst [vmem:[#allocation2 + $0x8] sm:$0xff] %v776_v22  ;;  %v705_v30 = vadd.f32 %v703_v40, %v647_v24  ;;  %v477_v28 = vmul.f32 %v476_v27, %v1530_v38  ;;  %v704_v33 = vmul.f32 %v702_v62, %v1739_v56  ;;  %v421_v37 = vadd.f32 %v419_v9, %v369_v41  ;;  %v791_v55 = vld [vmem:[#allocation2] sm:$0xfc]  ;;  %s1818_s12 = sld [smem:[#allocation7 + $0x84]] }
  0x83   : > { %v532_v32 = vadd.f32 %v530_v4, %v474_v26  ;;  %v535_v60 = vmul.f32 %v534_v29, %v1569_v2  ;;  %v762_v47 = vmul.f32 %v760_v57, %v1751_v23  ;;  %v650_v50 = vstv %s1746_s24  ;;  %s1821_s9 = sld [smem:[#allocation7 + $0x104]] }
  0x84   : > { %v763_v46 = vadd.f32 %v761_v17, %v705_v30  ;;  %v708_v52 = vstv %s1754_s30  ;;  %v479_v21 = vadd.f32 %v477_v28, %v421_v37  ;;  %v593_v58 = vmul.f32 %v592_v15, %v1607_v36  ;;  %s1826_s13 = sld [smem:[#allocation7 + $0x184]] }
  0x85   : > { %v590_v31 = vadd.f32 %v588_v16, %v532_v32  ;;  %v766_v59 = vstv %s1759_s28  ;;  %v651_v62 = vmul.f32 %v650_v50, %v1645_v12  ;;  %v370_v61 = vmul.f32 %v368_v5, %v1475_v49  ;;  %s1832_s14 = sld [smem:[#allocation7 + $0x204]]  ;;  %s325_s28 = scalar_lea.vmem %s1905_s5, %s1139_s15 }
  0x86   : > { %v795_v39 = vrot.slane %v763_v46, 6  ;;  %v420_v40 = vmul.f32 %v418_v53, %v1511_v20  ;;  %v537_v35 = vadd.f32 %v535_v60, %v479_v21  ;;  %v709_v43 = vmul.f32 %v708_v52, %v1679_v44  ;;  %s1836_s17 = sld [smem:[#allocation7 + $0x284]] }
  0x87   : > { %v648_v57 = vadd.f32 %v646_v18, %v590_v31  ;;  %v478_v48 = vmul.f32 %v476_v27, %v1552_v54  ;;  %v767_v13 = vmul.f32 %v766_v59, %v1709_v19  ;;  %v536_v51 = vmul.f32 %v534_v29, %v1617_v45  ;;  %s1841_s22 = sld [smem:[#allocation7 + $0x304]] }
  0x88   : > { %v799_v63 = vadd.f32 %v795_v39, %v791_v55  ;;  %v422_v17 = vadd.f32 %v420_v40, %v370_v61  ;;  %v595_v16 = vadd.f32 %v593_v58, %v537_v35  ;;  %v594_v18 = vmul.f32 %v592_v15, %v1672_v34  ;;  %s1848_s29 = sld [smem:[#allocation7 + $0x384]] }
  0x89   : > { %v706_v4 = vadd.f32 %v704_v33, %v648_v57  ;;  %v652_v22 = vmul.f32 %v650_v50, %v1714_v25  ;;  %v376_v5 = vstv %s1770_s26  ;;  %v430_v53 = vstv %s1775_s6  ;;  %v792_v28 = vld [vmem:[#allocation2 + $0x8] sm:$0xfc] }
  0x8a   : > { %801 = vst [vmem:[#allocation2] sm:$0xfc] %v799_v63  ;;  %v480_v24 = vadd.f32 %v478_v48, %v422_v17  ;;  %v488_v26 = vstv %s1780_s10  ;;  %v653_v9 = vadd.f32 %v651_v62, %v595_v16  ;;  %v377_v27 = vmul.f32 %v376_v5, %v1465_v42  ;;  %s315_s10 = scalar_lea.vmem %s1904_s4, %s1137_s23 }
  0x8b   : > { %v764_v41 = vadd.f32 %v762_v47, %v706_v4  ;;  %v431_v30 = vmul.f32 %v430_v53, %v1501_v14  ;;  %v489_v15 = vmul.f32 %v488_v26, %v1530_v38  ;;  %v546_v32 = vstv %s1784_s11 }
  0x8c   : > { %v538_v29 = vadd.f32 %v536_v51, %v480_v24  ;;  %v604_v33 = vstv %s1789_s25  ;;  %v711_v60 = vadd.f32 %v709_v43, %v653_v9  ;;  %v547_v47 = vmul.f32 %v546_v32, %v1569_v2 }
  0x8d   : > { %v796_v37 = vrot.slane %v764_v41, 6  ;;  %v433_v46 = vadd.f32 %v431_v30, %v377_v27  ;;  %v710_v55 = vmul.f32 %v708_v52, %v1739_v56  ;;  %v605_v31 = vmul.f32 %v604_v33, %v1607_v36 }
  0x8e   : > { %v596_v50 = vadd.f32 %v594_v18, %v538_v29  ;;  %v662_v21 = vstv %s1796_s7  ;;  %v769_v39 = vadd.f32 %v767_v13, %v711_v60  ;;  %v720_v61 = vstv %s1800_s16 }
  0x8f   : > { %v800_v58 = vadd.f32 %v796_v37, %v792_v28  ;;  %v491_v62 = vadd.f32 %v489_v15, %v433_v46  ;;  %v768_v57 = vmul.f32 %v766_v59, %v1751_v23  ;;  %v663_v35 = vmul.f32 %v662_v21, %v1645_v12 }
  0x90   : > { %v654_v40 = vadd.f32 %v652_v22, %v596_v50  ;;  %v378_v43 = vmul.f32 %v376_v5, %v1475_v49  ;;  %v807_v48 = vrot.slane %v769_v39, 7  ;;  %v778_v17 = vstv %s1806_s8 }
  0x91   : > { %802 = vst [vmem:[#allocation2 + $0x8] sm:$0xfc] %v800_v58  ;;  %v803_v52 = vld [vmem:[#allocation2] sm:$0xfe]  ;;  %v549_v63 = vadd.f32 %v547_v47, %v491_v62  ;;  %v432_v51 = vmul.f32 %v430_v53, %v1511_v20  ;;  %v721_v59 = vmul.f32 %v720_v61, %v1679_v44  ;;  %v490_v4 = vmul.f32 %v488_v26, %v1552_v54 }
  0x92   : > { %v712_v13 = vadd.f32 %v710_v55, %v654_v40  ;;  %v811_v16 = vadd.f32 %v807_v48, %v803_v52  ;;  %v548_v24 = vmul.f32 %v546_v32, %v1617_v45  ;;  %v779_v53 = vmul.f32 %v778_v17, %v1709_v19 }
  0x93   : > { %v607_v18 = vadd.f32 %v605_v31, %v549_v63  ;;  %v434_v22 = vadd.f32 %v432_v51, %v378_v43  ;;  %v606_v41 = vmul.f32 %v604_v33, %v1672_v34  ;;  %v380_v9 = vstv %s1813_s21 }
  0x94   : > { %v770_v5 = vadd.f32 %v768_v57, %v712_v13  ;;  %813 = vst [vmem:[#allocation2] sm:$0xfe] %v811_v16  ;;  %v381_v26 = vmul.f32 %v380_v9, %v1465_v42  ;;  %v436_v28 = vstv %s1818_s12  ;;  %v494_v32 = vstv %s1821_s9 }
  0x95   : > { %v665_v27 = vadd.f32 %v663_v35, %v607_v18  ;;  %v492_v30 = vadd.f32 %v490_v4, %v434_v22  ;;  %v437_v15 = vmul.f32 %v436_v28, %v1501_v14  ;;  %v552_v37 = vstv %s1826_s13 }
  0x96   : > { %v808_v29 = vrot.slane %v770_v5, 7  ;;  %v664_v33 = vmul.f32 %v662_v21, %v1714_v25  ;;  %v495_v47 = vmul.f32 %v494_v32, %v1530_v38  ;;  %v722_v55 = vmul.f32 %v720_v61, %v1739_v56 }
  0x97   : > { %v723_v60 = vadd.f32 %v721_v59, %v665_v27  ;;  %v550_v46 = vadd.f32 %v548_v24, %v492_v30  ;;  %v439_v42 = vadd.f32 %v437_v15, %v381_v26  ;;  %v553_v31 = vmul.f32 %v552_v37, %v1569_v2 }
  0x98   : > { %v804_v50 = vld [vmem:[#allocation2 + $0x8] sm:$0xfe]  ;;  %v610_v58 = vstv %s1832_s14  ;;  %v668_v14 = vstv %s1836_s17  ;;  %v780_v57 = vmul.f32 %v778_v17, %v1751_v23  ;;  %v726_v52 = vstv %s1841_s22 }
  0x99   : > { %v812_v39 = vadd.f32 %v808_v29, %v804_v50  ;;  %v781_v62 = vadd.f32 %v779_v53, %v723_v60  ;;  %v608_v40 = vadd.f32 %v606_v41, %v550_v46  ;;  %v497_v35 = vadd.f32 %v495_v47, %v439_v42 }
  0x9a   : > { %v611_v21 = vmul.f32 %v610_v58, %v1607_v36  ;;  %v382_v61 = vmul.f32 %v380_v9, %v1475_v49  ;;  %v669_v2 = vmul.f32 %v668_v14, %v1645_v12  ;;  %v438_v51 = vmul.f32 %v436_v28, %v1511_v20 }
  0x9b   : > { %814 = vst [vmem:[#allocation2 + $0x8] sm:$0xfe] %v812_v39  ;;  %v819_v38 = vrot.slane %v781_v62, 1  ;;  %v666_v43 = vadd.f32 %v664_v33, %v608_v40  ;;  %v815_v48 = vld [vmem:[#allocation2] sm:$0x7f]  ;;  %v555_v63 = vadd.f32 %v553_v31, %v497_v35  ;;  %v496_v13 = vmul.f32 %v494_v32, %v1552_v54 }
  0x9c   : > { %v784_v17 = vstv %s1848_s29  ;;  %v727_v36 = vmul.f32 %v726_v52, %v1679_v44  ;;  %v440_v18 = vadd.f32 %v438_v51, %v382_v61  ;;  %v554_v22 = vmul.f32 %v552_v37, %v1617_v45 }
  0x9d   : > { %v823_v59 = vadd.f32 %v819_v38, %v815_v48  ;;  %v724_v4 = vadd.f32 %v722_v55, %v666_v43  ;;  %v613_v16 = vadd.f32 %v611_v21, %v555_v63  ;;  %v785_v5 = vmul.f32 %v784_v17, %v1709_v19 }
  0x9e   : > { %v498_v53 = vadd.f32 %v496_v13, %v440_v18  ;;  %v612_v12 = vmul.f32 %v610_v58, %v1672_v34  ;;  %v670_v27 = vmul.f32 %v668_v14, %v1714_v25  ;;  %v728_v28 = vmul.f32 %v726_v52, %v1739_v56 }
  0x9f   : > { %825 = vst [vmem:[#allocation2] sm:$0x7f] %v823_v59  ;;  %v782_v24 = vadd.f32 %v780_v57, %v724_v4  ;;  %v671_v49 = vadd.f32 %v669_v2, %v613_v16  ;;  %v786_v19 = vmul.f32 %v784_v17, %v1751_v23 }
  0xa0   : > { %v556_v9 = vadd.f32 %v554_v22, %v498_v53 }
  0xa1   : > { %v820_v20 = vrot.slane %v782_v24, 1  ;;  %v729_v54 = vadd.f32 %v727_v36, %v671_v49 }
  0xa2   : > { %v816_v41 = vld [vmem:[#allocation2 + $0x8] sm:$0x7f]  ;;  %v614_v44 = vadd.f32 %v612_v12, %v556_v9 }
  0xa3   : > { %v824_v30 = vadd.f32 %v820_v20, %v816_v41  ;;  %v787_v26 = vadd.f32 %v785_v5, %v729_v54 }
  0xa4   : > { %v672_v15 = vadd.f32 %v670_v27, %v614_v44 }
  0xa5   : > { %826 = vst [vmem:[#allocation2 + $0x8] sm:$0x7f] %v824_v30  ;;  %v831_v29 = vrot.slane %v787_v26, 2 }
  0xa6   : > { %v827_v45 = vld [vmem:[#allocation2] sm:$0x3f]  ;;  %v730_v37 = vadd.f32 %v728_v28, %v672_v15 }
  0xa7   : > { %v835_v32 = vadd.f32 %v831_v29, %v827_v45 }
  0xa8   : > { %v788_v34 = vadd.f32 %v786_v19, %v730_v37 }
  0xa9   : > { %837 = vst [vmem:[#allocation2] sm:$0x3f] %v835_v32 }
  0xaa   : > { %v832_v46 = vrot.slane %v788_v34, 2 }
  0xac   : > { %v828_v60 = vld [vmem:[#allocation2 + $0x8] sm:$0x3f] }
  0xad   : > { %v836_v33 = vadd.f32 %v832_v46, %v828_v60 }
  0xaf   : > { %838 = vst [vmem:[#allocation2 + $0x8] sm:$0x3f] %v836_v33 }
  0xb0   : > { %v839_v25 = vld [vmem:[#allocation2] sm:$0xff] }
  0xb1   : > { %v1133_v47 = vmul.f32 -1.442695, %v839_v25 }
  0xb3   : > { %1195 = vpow2.f32 %v1133_v47 }
  0xb6   : > { %v840_v56 = vld [vmem:[#allocation2 + $0x8] sm:$0xff] }
  0xb7   : > { %v1134_v50 = vmul.f32 -1.442695, %v840_v56 }
  0xb9   : > { %1197 = vpow2.f32 %v1134_v50 }
  0xc0   : > { %v1196_v55 = vpop.eup %1195 }
  0xc1   : > { %v847_v42 = vadd.f32 1.0, %v1196_v55 }
  0xc3   : > { %1199 = vrcp.f32 %v847_v42 }
  0xc6   : > { %v1198_v23 = vpop.eup %1197 }
  0xc7   : > { %v848_v31 = vadd.f32 1.0, %v1198_v23 }
  0xc9   : > { %1201 = vrcp.f32 %v848_v31 }
  0xd0   : > { %v1200_v58 = vpop.eup %1199 }
  0xd1   : > { %853 = vst [vmem:[%s325_s28] sm:$0xff] %v1200_v58  ;;  %v855_v39 = vmul.f32 %v1200_v58, %v1406_v0  ;;  %v857_v62 = vmul.f32 %v1200_v58, %v1408_v1  ;;  %v859_v40 = vmul.f32 %v1200_v58, %v1412_v3  ;;  %v861_v14 = vmul.f32 %v1200_v58, %v1421_v8 }
  0xd3   : > { %863 = vst [vmem:[%s315_s10] sm:$0xff] %v855_v39  ;;  %865 = vst [vmem:[%s315_s10 + $0x10] sm:$0xff] %v857_v62 }
  0xd4   : > { %867 = vst [vmem:[%s315_s10 + $0x20] sm:$0xff] %v859_v40  ;;  %869 = vst [vmem:[%s315_s10 + $0x30] sm:$0xff] %v861_v14 }
  0xd6   : > { %v1202_v57 = vpop.eup %1201 }
  0xd7   : > { %854 = vst [vmem:[%s325_s28 + $0x8] sm:$0xff] %v1202_v57  ;;  %v856_v35 = vmul.f32 %v1202_v57, %v1417_v6  ;;  %v858_v21 = vmul.f32 %v1202_v57, %v1419_v7  ;;  %v860_v38 = vmul.f32 %v1202_v57, %v1426_v10  ;;  %v862_v0 = vmul.f32 %v1202_v57, %v1428_v11 }
  0xd9   : > { %864 = vst [vmem:[%s315_s10 + $0x8] sm:$0xff] %v856_v35  ;;  %866 = vst [vmem:[%s315_s10 + $0x18] sm:$0xff] %v858_v21 }
  0xda   : > { %868 = vst [vmem:[%s315_s10 + $0x28] sm:$0xff] %v860_v38  ;;  %870 = vst [vmem:[%s315_s10 + $0x38] sm:$0xff] %v862_v0 }
  0xdb PF: > { %s18_s20 = sadd.s32 1, %s1278_s20   ;;  %s1915_s18 = smov %s1274_s19 }
  0xdc   : > { %p15_p5 = scmp.ge.s32.totalorder %s18_s20, 4   ;;  %s1916_s19 = smov %s1918_s27 }
  0xde   :  { %17 = sbr.rel (!%p15_p5) target bundleno = 3 (0x3), region = 91 }
  0xe3   :  { %926 = vsyncpa [#allocation4], 1 }
  0xe4   :  { %928 = vsyncpa [#allocation4 + $0x1], 1 }
  0xe5   :  { %929 = vsyncpa [#allocation6], 1 }

</bundles_post_ra>
